<compile_context>
chip_gen: v7x
topology: tpu7x:2x2x1
jax: 0.10.0
libtpu: 0.0.40
codegen_flags: <defaults>
</compile_context>

<pallas_src>
import jax
import jax.numpy as jnp
import numpy as np
from jax.experimental import pallas as pl
from jax.experimental.pallas import tpu as pltpu

BN_EPS = 1e-5  # nn.BatchNorm2d default


def _round_up(x: int, m: int) -> int:
    return (x + m - 1) // m * m


# -----------------------------------------------------------------------------
# Pass 1: transposed-conv phase GEMM + ELU + per-tile BatchNorm partial stats.
# -----------------------------------------------------------------------------
def _gemm_elu_stats_kernel(p_ref, w_ref, y_ref, stat_ref):
    # (TM, K) x (K, C_pad) on the MXU, f32 accumulation.
    y = jnp.dot(p_ref[...], w_ref[...], preferred_element_type=jnp.float32)
    # ELU (alpha=1). exp() on the clamped negative branch (EUP slot); ~1e-7 abs error
    # vs expm1 near 0, far below the comparison tolerance.
    y = jnp.where(y > 0.0, y, jnp.exp(jnp.minimum(y, 0.0)) - 1.0)
    y_ref[...] = y.astype(y_ref.dtype)
    # Per-tile, per-channel partials for the batch statistics.  Zero-padded rows and
    # zero-padded channels contribute exact zeros.
    s = jnp.sum(y, axis=0, keepdims=True)          # (1, C_pad)
    ss = jnp.sum(y * y, axis=0, keepdims=True)     # (1, C_pad)
    stat_ref[...] = jnp.concatenate([s, ss], axis=0)   # (2, C_pad)


# -----------------------------------------------------------------------------
# Pass 2: BatchNorm normalize (elementwise y * scale + shift).
# -----------------------------------------------------------------------------
def _bn_apply_kernel(y_ref, scale_ref, shift_ref, o_ref):
    o_ref[...] = y_ref[...] * scale_ref[...] + shift_ref[...]


def trans_conv_layer(x, w, gamma, beta, *, stride=2, pad=1, block_m=256):
    """Forward pass of TransConvLayer (dropout=None).

    x: (N, C_in, H, W) NCHW.  w: (C_in, C_out, ks, ks) (PyTorch ConvTranspose2d layout).
    gamma/beta: (C_out,) BatchNorm2d affine params.  Returns (N, C_out, H_out, W_out).

    block_m: GEMM tile rows.  Guidance: ~512-1024 on v6e (128 MiB VMEM), 128-256 on v5e,
    <=256-512 on v7x (64 MiB VMEM shared by 2 TensorCores; both grid axes are 'parallel').
    """
    N, C_in, H, W = x.shape
    _, C_out, ks, _ = w.shape
    H_out = (H - 1) * stride - 2 * pad + ks
    W_out = (W - 1) * stride - 2 * pad + ks

    # ---- static bookkeeping for the stride x stride sub-pixel decomposition ----------
    phases = [(ph, pw) for ph in range(stride) for pw in range(stride)]
    n_phases = len(phases)
    h_per_phase = [len(range(ph, H_out, stride)) for ph in range(stride)]
    w_per_phase = [len(range(pw, W_out, stride)) for pw in range(stride)]

    taps_per_dim = -(-ks // stride)                      # ceil(ks / stride)
    K_max = C_in * taps_per_dim * taps_per_dim
    K_pad = _round_up(K_max, 8)                          # sublane-aligned contraction
    C_pad = _round_up(C_out, 128)                        # lane-dense output channels

    M_max = max(N * h_per_phase[ph] * w_per_phase[pw] for (ph, pw) in phases)
    TM = min(block_m, _round_up(M_max, 8))
    M_pad = _round_up(M_max, TM)
    n_m_tiles = M_pad // TM

    # ---- build per-phase GEMM operands (XLA glue: strided slices, pads, stacks) ------
    halo = ks + pad
    x_h = jnp.pad(x, ((0, 0), (0, 0), (halo, halo), (halo, halo)))

    patch_list, wmat_list = [], []
    for (ph, pw) in phases:
        hh, ww = h_per_phase[ph], w_per_phase[pw]
        taps_h = [kh for kh in range(ks) if (kh - ph - pad) % stride == 0]
        taps_w = [kw for kw in range(ks) if (kw - pw - pad) % stride == 0]
        cols, wrows = [], []
        for kh in taps_h:
            bh = (ph + pad - kh) // stride               # exact by construction
            for kw in taps_w:
                bw = (pw + pad - kw) // stride
                cols.append(x_h[:, :, halo + bh: halo + bh + hh,
                                halo + bw: halo + bw + ww])   # (N, C_in, hh, ww)
                wrows.append(w[:, :, kh, kw])                  # (C_in, C_out)
        k_valid = len(cols) * C_in
        pt = jnp.stack(cols, axis=2)                     # (N, C_in, taps, hh, ww)
        pt = pt.transpose(0, 3, 4, 2, 1)                 # (N, hh, ww, taps, C_in)
        pt = pt.reshape(N * hh * ww, k_valid)
        pt = jnp.pad(pt, ((0, M_pad - N * hh * ww), (0, K_pad - k_valid)))
        wm = jnp.concatenate(wrows, axis=0)              # (taps*C_in, C_out); matches pt cols
        wm = jnp.pad(wm, ((0, K_pad - k_valid), (0, C_pad - C_out)))
        patch_list.append(pt)
        wmat_list.append(wm)
    patches = jnp.stack(patch_list, axis=0).astype(jnp.float32)  # (n_phases, M_pad, K_pad)
    w_mats = jnp.stack(wmat_list, axis=0).astype(jnp.float32)    # (n_phases, K_pad, C_pad)

    grid = (n_phases, n_m_tiles)
    parallel = pltpu.CompilerParams(dimension_semantics=("parallel", "parallel"))

    # ---- pass 1: fused GEMM + ELU + stats partials ------------------------------------
    y_elu, stats = pl.pallas_call(
        _gemm_elu_stats_kernel,
        out_shape=(
            jax.ShapeDtypeStruct((n_phases, M_pad, C_pad), jnp.float32),
            jax.ShapeDtypeStruct((n_phases, n_m_tiles, 2, C_pad), jnp.float32),
        ),
        grid_spec=pltpu.PrefetchScalarGridSpec(
            num_scalar_prefetch=0,
            grid=grid,
            in_specs=[
                pl.BlockSpec((None, TM, K_pad), lambda p, i: (p, i, 0)),
                pl.BlockSpec((None, K_pad, C_pad), lambda p, i: (p, 0, 0)),
            ],
            out_specs=(
                pl.BlockSpec((None, TM, C_pad), lambda p, i: (p, i, 0)),
                pl.BlockSpec((None, None, 2, C_pad), lambda p, i: (p, i, 0, 0)),
            ),
        ),
        compiler_params=parallel,
    )(patches, w_mats)

    # ---- finish batch statistics (tiny) and fold BN affine into scale/shift -----------
    m_valid = float(N * H_out * W_out)   # padded rows/channels contributed exact zeros
    sums = jnp.sum(stats, axis=(0, 1))                          # (2, C_pad)
    mean = sums[0] / m_valid
    var = jnp.maximum(sums[1] / m_valid - mean * mean, 0.0)     # biased (training mode)
    inv_std = jax.lax.rsqrt(var + BN_EPS)
    gamma_p = jnp.zeros((C_pad,), jnp.float32).at[:C_out].set(gamma.astype(jnp.float32))
    beta_p = jnp.zeros((C_pad,), jnp.float32).at[:C_out].set(beta.astype(jnp.float32))
    scale = (gamma_p * inv_std).reshape(1, C_pad)
    shift = (beta_p - mean * gamma_p * inv_std).reshape(1, C_pad)
    # TODO(synk): BatchNorm running_mean/running_var buffer updates (training-time side
    # effect of nn.BatchNorm2d) are not produced; only forward normalization is computed.

    # ---- pass 2: apply normalization ---------------------------------------------------
    y_norm = pl.pallas_call(
        _bn_apply_kernel,
        out_shape=jax.ShapeDtypeStruct((n_phases, M_pad, C_pad), jnp.float32),
        grid_spec=pltpu.PrefetchScalarGridSpec(
            num_scalar_prefetch=0,
            grid=grid,
            in_specs=[
                pl.BlockSpec((None, TM, C_pad), lambda p, i: (p, i, 0)),
                pl.BlockSpec((1, C_pad), lambda p, i: (0, 0)),
                pl.BlockSpec((1, C_pad), lambda p, i: (0, 0)),
            ],
            out_specs=pl.BlockSpec((None, TM, C_pad), lambda p, i: (p, i, 0)),
        ),
        compiler_params=parallel,
    )(y_elu, scale, shift)

    # ---- interleave phases back into NHWC, then NCHW (module contract) -----------------
    out = jnp.zeros((N, H_out, W_out, C_out), jnp.float32)
    for idx, (ph, pw) in enumerate(phases):
        hh, ww = h_per_phase[ph], w_per_phase[pw]
        blk = y_norm[idx, :N * hh * ww, :C_out].reshape(N, hh, ww, C_out)
        out = out.at[:, ph::stride, pw::stride, :].set(blk)
    return out.transpose(0, 3, 1, 2)


def _reference(x, w, gamma, beta, stride=2, pad=1):
    """Pure-JAX reference using the direct scatter formula of ConvTranspose2d."""
    N, C_in, H, W = x.shape
    _, C_out, ks, _ = w.shape
    H_full = (H - 1) * stride + ks
    W_full = (W - 1) * stride + ks
    out = jnp.zeros((N, C_out, H_full, W_full), jnp.float32)
    for kh in range(ks):
        for kw in range(ks):
            contrib = jnp.einsum('nchw,cd->ndhw', x, w[:, :, kh, kw])
            out = out.at[:, :,
                         kh:kh + (H - 1) * stride + 1:stride,
                         kw:kw + (W - 1) * stride + 1:stride].add(contrib)
    H_out = (H - 1) * stride - 2 * pad + ks
    W_out = (W - 1) * stride - 2 * pad + ks
    out = out[:, :, pad:pad + H_out, pad:pad + W_out]
    out = jnp.where(out > 0.0, out, jnp.expm1(out))
    mean = out.mean(axis=(0, 2, 3), keepdims=True)
    var = ((out - mean) ** 2).mean(axis=(0, 2, 3), keepdims=True)
    return (out - mean) / jnp.sqrt(var + BN_EPS) * gamma.reshape(1, -1, 1, 1) \
        + beta.reshape(1, -1, 1, 1)


if __name__ == "__main__":
    key = jax.random.PRNGKey(0)
    k1, k2, k3, k4 = jax.random.split(key, 4)

    N, C_in, C_out, H, W, ks = 2, 4, 8, 16, 16, 3
    x = jax.random.normal(k1, (N, C_in, H, W), jnp.float32)
    # PyTorch ConvTranspose2d weight layout: (C_in, C_out, ks, ks).
    w = 0.1 * jax.random.normal(k2, (C_in, C_out, ks, ks), jnp.float32)
    # BatchNorm affine params (random to exercise the path).
    gamma = 1.0 + 0.1 * jax.random.normal(k3, (C_out,), jnp.float32)
    beta = 0.1 * jax.random.normal(k4, (C_out,), jnp.float32)

    out = jax.jit(trans_conv_layer)(x, w, gamma, beta)
    out = jax.block_until_ready(out)

    ref = _reference(x, w, gamma, beta)
    np.testing.assert_allclose(np.asarray(out), np.asarray(ref), rtol=2e-3, atol=2e-3)
    print("KERNEL_OK")
</pallas_src>

<mosaic_0001>
module attributes {stable_mosaic.version = 11 : i64} {
  func.func @_gemm_elu_stats_kernel(%arg0: i32, %arg1: i32, %arg2: memref<1x256x16xf32, #tpu.memory_space<vmem>>, %arg3: memref<1x16x128xf32, #tpu.memory_space<vmem>>, %arg4: memref<1x256x128xf32, #tpu.memory_space<vmem>>, %arg5: memref<1x1x2x128xf32, #tpu.memory_space<vmem>>) attributes {dimension_semantics = [#tpu.dimension_semantics<parallel>, #tpu.dimension_semantics<parallel>], iteration_bounds = array<i64: 4, 2>, scalar_prefetch = 0 : i64, scratch_operands = 0 : i64, tpu.core_type = #tpu.core_type<tc>, window_params = [{transform_indices = @transform_0, window_bounds = array<i64: 1, 256, 16>}, {transform_indices = @transform_1, window_bounds = array<i64: 1, 16, 128>}, {transform_indices = @transform_2, window_bounds = array<i64: 1, 256, 128>}, {transform_indices = @transform_3, window_bounds = array<i64: 1, 1, 2, 128>}]} {
    %c0 = arith.constant 0 : index
    %c0_0 = arith.constant 0 : index
    %c0_1 = arith.constant 0 : index
    %0 = vector.load %arg2[%c0, %c0_0, %c0_1] : memref<1x256x16xf32, #tpu.memory_space<vmem>>, vector<1x256x16xf32>
    %1 = vector.shape_cast %0 : vector<1x256x16xf32> to vector<256x16xf32>
    %c0_2 = arith.constant 0 : index
    %c0_3 = arith.constant 0 : index
    %c0_4 = arith.constant 0 : index
    %2 = vector.load %arg3[%c0_2, %c0_3, %c0_4] : memref<1x16x128xf32, #tpu.memory_space<vmem>>, vector<1x16x128xf32>
    %3 = vector.shape_cast %2 : vector<1x16x128xf32> to vector<16x128xf32>
    %cst = arith.constant dense<0.000000e+00> : vector<256x128xf32>
    %4 = tpu.matmul %1, %3, %cst {dimension_numbers = #tpu.dot_dimension_numbers<[1], [0], [0], [1], [0, 0, 1, 1], [], []>} : vector<256x16xf32>, vector<16x128xf32>, vector<256x128xf32> -> vector<256x128xf32>
    %cst_5 = arith.constant 0.000000e+00 : f32
    %5 = vector.broadcast %cst_5 : f32 to vector<256x128xf32>
    %6 = arith.cmpf ogt, %4, %5 : vector<256x128xf32>
    %cst_6 = arith.constant 0.000000e+00 : f32
    %7 = vector.broadcast %cst_6 : f32 to vector<256x128xf32>
    %8 = arith.minimumf %4, %7 : vector<256x128xf32>
    %9 = math.exp %8 : vector<256x128xf32>
    %cst_7 = arith.constant 1.000000e+00 : f32
    %10 = vector.broadcast %cst_7 : f32 to vector<256x128xf32>
    %11 = arith.subf %9, %10 : vector<256x128xf32>
    %12 = arith.select %6, %4, %11 : vector<256x128xi1>, vector<256x128xf32>
    %c0_8 = arith.constant 0 : index
    %c0_9 = arith.constant 0 : index
    %c0_10 = arith.constant 0 : index
    %13 = vector.load %arg4[%c0_8, %c0_9, %c0_10] : memref<1x256x128xf32, #tpu.memory_space<vmem>>, vector<1x256x128xf32>
    %14 = vector.shape_cast %13 : vector<1x256x128xf32> to vector<256x128xf32>
    %15 = vector.shape_cast %12 : vector<256x128xf32> to vector<1x256x128xf32>
    tpu.vector_store %arg4[%c0_8, %c0_9, %c0_10], %15 {strides = array<i32>} : memref<1x256x128xf32, #tpu.memory_space<vmem>>, vector<1x256x128xf32>,
    %cst_11 = arith.constant dense<0.000000e+00> : vector<128xf32>
    %16 = vector.multi_reduction <add>, %12, %cst_11 [0] : vector<256x128xf32> to vector<128xf32>
    %17 = vector.shape_cast %16 : vector<128xf32> to vector<1x128xf32>
    %18 = arith.mulf %12, %12 : vector<256x128xf32>
    %cst_12 = arith.constant dense<0.000000e+00> : vector<128xf32>
    %19 = vector.multi_reduction <add>, %18, %cst_12 [0] : vector<256x128xf32> to vector<128xf32>
    %20 = vector.shape_cast %19 : vector<128xf32> to vector<1x128xf32>
    %21 = tpu.concatenate %17, %20 in 0 : vector<1x128xf32>, vector<1x128xf32> -> vector<2x128xf32>
    %c0_13 = arith.constant 0 : index
    %c0_14 = arith.constant 0 : index
    %c0_15 = arith.constant 0 : index
    %c0_16 = arith.constant 0 : index
    %22 = vector.load %arg5[%c0_13, %c0_14, %c0_15, %c0_16] : memref<1x1x2x128xf32, #tpu.memory_space<vmem>>, vector<1x1x2x128xf32>
    %23 = vector.shape_cast %22 : vector<1x1x2x128xf32> to vector<2x128xf32>
    %24 = vector.shape_cast %21 : vector<2x128xf32> to vector<1x1x2x128xf32>
    tpu.vector_store %arg5[%c0_13, %c0_14, %c0_15, %c0_16], %24 {strides = array<i32>} : memref<1x1x2x128xf32, #tpu.memory_space<vmem>>, vector<1x1x2x128xf32>,
    return
  }
  func.func @transform_0(%arg0: i32, %arg1: i32) -> (i32, i32, i32) {
    %c0_i32 = arith.constant 0 : i32
    %c0_i32_0 = arith.constant 0 : i32
    return %arg0, %arg1, %c0_i32 : i32, i32, i32
  }
  func.func @transform_1(%arg0: i32, %arg1: i32) -> (i32, i32, i32) {
    %c0_i32 = arith.constant 0 : i32
    %c0_i32_0 = arith.constant 0 : i32
    %c0_i32_1 = arith.constant 0 : i32
    return %arg0, %c0_i32, %c0_i32_0 : i32, i32, i32
  }
  func.func @transform_2(%arg0: i32, %arg1: i32) -> (i32, i32, i32) {
    %c0_i32 = arith.constant 0 : i32
    %c0_i32_0 = arith.constant 0 : i32
    return %arg0, %arg1, %c0_i32 : i32, i32, i32
  }
  func.func @transform_3(%arg0: i32, %arg1: i32) -> (i32, i32, i32, i32) {
    %c0_i32 = arith.constant 0 : i32
    %c0_i32_0 = arith.constant 0 : i32
    %c0_i32_1 = arith.constant 0 : i32
    return %arg0, %arg1, %c0_i32, %c0_i32_0 : i32, i32, i32, i32
  }
}

module attributes {stable_mosaic.version = 11 : i64} {
  func.func @_bn_apply_kernel(%arg0: i32, %arg1: i32, %arg2: memref<1x256x128xf32, #tpu.memory_space<vmem>>, %arg3: memref<1x128xf32, #tpu.memory_space<vmem>>, %arg4: memref<1x128xf32, #tpu.memory_space<vmem>>, %arg5: memref<1x256x128xf32, #tpu.memory_space<vmem>>) attributes {dimension_semantics = [#tpu.dimension_semantics<parallel>, #tpu.dimension_semantics<parallel>], iteration_bounds = array<i64: 4, 2>, scalar_prefetch = 0 : i64, scratch_operands = 0 : i64, tpu.core_type = #tpu.core_type<tc>, window_params = [{transform_indices = @transform_0, window_bounds = array<i64: 1, 256, 128>}, {pipeline_mode = #tpu.pipeline_mode<synchronous>, transform_indices = @transform_1, window_bounds = array<i64: 1, 128>}, {pipeline_mode = #tpu.pipeline_mode<synchronous>, transform_indices = @transform_2, window_bounds = array<i64: 1, 128>}, {transform_indices = @transform_3, window_bounds = array<i64: 1, 256, 128>}]} {
    %c0 = arith.constant 0 : index
    %c0_0 = arith.constant 0 : index
    %c0_1 = arith.constant 0 : index
    %0 = vector.load %arg2[%c0, %c0_0, %c0_1] : memref<1x256x128xf32, #tpu.memory_space<vmem>>, vector<1x256x128xf32>
    %1 = vector.shape_cast %0 : vector<1x256x128xf32> to vector<256x128xf32>
    %c0_2 = arith.constant 0 : index
    %c0_3 = arith.constant 0 : index
    %2 = vector.load %arg3[%c0_2, %c0_3] : memref<1x128xf32, #tpu.memory_space<vmem>>, vector<1x128xf32>
    %3 = vector.broadcast %2 : vector<1x128xf32> to vector<256x128xf32>
    %4 = arith.mulf %1, %3 : vector<256x128xf32>
    %c0_4 = arith.constant 0 : index
    %c0_5 = arith.constant 0 : index
    %5 = vector.load %arg4[%c0_4, %c0_5] : memref<1x128xf32, #tpu.memory_space<vmem>>, vector<1x128xf32>
    %6 = vector.broadcast %5 : vector<1x128xf32> to vector<256x128xf32>
    %7 = arith.addf %4, %6 : vector<256x128xf32>
    %c0_6 = arith.constant 0 : index
    %c0_7 = arith.constant 0 : index
    %c0_8 = arith.constant 0 : index
    %8 = vector.load %arg5[%c0_6, %c0_7, %c0_8] : memref<1x256x128xf32, #tpu.memory_space<vmem>>, vector<1x256x128xf32>
    %9 = vector.shape_cast %8 : vector<1x256x128xf32> to vector<256x128xf32>
    %10 = vector.shape_cast %7 : vector<256x128xf32> to vector<1x256x128xf32>
    tpu.vector_store %arg5[%c0_6, %c0_7, %c0_8], %10 {strides = array<i32>} : memref<1x256x128xf32, #tpu.memory_space<vmem>>, vector<1x256x128xf32>,
    return
  }
  func.func @transform_0(%arg0: i32, %arg1: i32) -> (i32, i32, i32) {
    %c0_i32 = arith.constant 0 : i32
    %c0_i32_0 = arith.constant 0 : i32
    return %arg0, %arg1, %c0_i32 : i32, i32, i32
  }
  func.func @transform_1(%arg0: i32, %arg1: i32) -> (i32, i32) {
    %c0_i32 = arith.constant 0 : i32
    %c0_i32_0 = arith.constant 0 : i32
    %c0_i32_1 = arith.constant 0 : i32
    return %c0_i32, %c0_i32_0 : i32, i32
  }
  func.func @transform_2(%arg0: i32, %arg1: i32) -> (i32, i32) {
    %c0_i32 = arith.constant 0 : i32
    %c0_i32_0 = arith.constant 0 : i32
    %c0_i32_1 = arith.constant 0 : i32
    return %c0_i32, %c0_i32_0 : i32, i32
  }
  func.func @transform_3(%arg0: i32, %arg1: i32) -> (i32, i32, i32) {
    %c0_i32 = arith.constant 0 : i32
    %c0_i32_0 = arith.constant 0 : i32
    return %arg0, %arg1, %c0_i32 : i32, i32, i32
  }
}

</mosaic_0001>

<bundles_post_ra>
// kernel: squeeze.29
= control target key start
LH: loop header
LB: loop body
LE: loop exit
PB: predicated region body
PF: predicated region fallthrough
CT: control target
= control target key end

     0   :  { %vm562_vm0 = vcmask 973824   ;;  %vm645_vm1 = vcmask 1039360   ;;  %vm603_vm2 = vcmask 982016   ;;  %s1000_s14 = smov 1   ;;  %vm3_vm3 = vcmask 121856   ;;  %s1001_s2 = smov 8   ;;  %s2131_s0 = inlined_call_operand.vmem [shape: f32[1,450,8], index: 0, kind: input, shape index: {}]   ;;  %s2132_s1 = inlined_call_operand.vmem [shape: f32[2,15,15,8], index: 1, kind: output, shape index: {}]  }
   0x1   :  { %v1041_v0 = vld [vmem:[%s2131_s0 + $0x10] sm:$0xff]   ;;  %v918_v1 = vld [vmem:[%s2131_s0 + $0x18] sm:$0xff]   ;;  %v1049_v2 = vld [vmem:[%s2131_s0 + $0x8] sm:$0xff]   ;;  %s1002_s3 = smov 122   ;;  %s1003_s4 = smov 121   ;;  %vm566_vm4 = vcmask 72704  }
   0x2   :  { %v563_v3 = vsel %vm562_vm0, %v918_v1, %v1041_v0  ;;  %v646_v4 = vsel %vm645_vm1, %v1041_v0, %v1049_v2  ;;  %v1057_v5 = vld [vmem:[%s2131_s0] sm:$0xff]   ;;  %s999_s0 = smov 9   ;;  %s1004_s5 = smov 114   ;;  %vm649_vm5 = vcmask 7168   ;;  %vm583_vm6 = vcmask 121928  }
   0x3   :  { %564 = vrot.lane.b32.xlu0 %v563_v3, %s999_s0  ;;  %647 = vrot.lane.b32.xlu1 %v646_v4, %s1000_s14  ;;  %v604_v6 = vsel %vm603_vm2, %v1049_v2, %v1057_v5  ;;  %4 = vst.msk [vmem:[%s2132_s1] sm:$0x1] %vm3_vm3, %v1057_v5   ;;  %683 = vst.msk [vmem:[%s2132_s1 + $0x1f] sm:$0x2] %vm3_vm3, %v1057_v5   ;;  %s1005_s6 = smov 113   ;;  %s1006_s7 = smov 107  }
   0x4   :  { %684 = vst.msk [vmem:[%s2132_s1 + $0x3e] sm:$0x4] %vm3_vm3, %v1057_v5   ;;  %685 = vst.msk [vmem:[%s2132_s1 + $0x5d] sm:$0x8] %vm3_vm3, %v1057_v5   ;;  %s1007_s8 = smov 106   ;;  %s1008_s9 = smov 99  }
   0x5   :  { %686 = vst.msk [vmem:[%s2132_s1 + $0x7c] sm:$0x10] %vm3_vm3, %v1057_v5   ;;  %687 = vst.msk [vmem:[%s2132_s1 + $0x9b] sm:$0x20] %vm3_vm3, %v1057_v5   ;;  %s1009_s10 = smov 98   ;;  %s1010_s11 = smov 92  }
   0x6   :  { %688 = vst.msk [vmem:[%s2132_s1 + $0xba] sm:$0x40] %vm3_vm3, %v1057_v5   ;;  %689 = vst.msk [vmem:[%s2132_s1 + $0xd9] sm:$0x80] %vm3_vm3, %v1057_v5   ;;  %s1011_s12 = smov 91   ;;  %s1012_s13 = smov 84  }
   0x7   :  { %605 = vrot.lane.b32.xlu0 %v604_v6, %s1001_s2  ;;  %21 = vrot.lane.b32.xlu1 %v918_v1, %s1002_s3  ;;  %s1013_s0 = smov 83   ;;  %s1014_s14 = smov 77   ;;  %vm666_vm7 = vcmask 121864   ;;  %vm607_vm8 = vcmask 64512   ;;  %vm624_vm9 = vcmask 121920  }
   0x8   :  { %s1015_s15 = smov 76   ;;  %s1016_s16 = smov 69  }
   0x9   :  { %s1017_s17 = smov 68   ;;  %s1018_s18 = smov 61  }
   0xa   :  { %s1019_s19 = smov 54   ;;  %s1020_s20 = smov 53  }
   0xb   :  { %42 = vrot.lane.b32.xlu0 %v1049_v2, %s1003_s4  ;;  %63 = vrot.lane.b32.xlu1 %v1041_v0, %s1004_s5  ;;  %s1021_s21 = smov 46   ;;  %s1022_s22 = smov 39  }
   0xc   :  { %s1023_s23 = smov 38   ;;  %s1024_s24 = smov 31  }
   0xd   :  { %s1025_s25 = smov 24   ;;  %s1026_s26 = smov 23  }
   0xe   :  { %s1027_s27 = smov 16  }
   0xf   :  { %83 = vrot.lane.b32.xlu0 %v1057_v5, %s1005_s6  ;;  %104 = vrot.lane.b32.xlu1 %v918_v1, %s1006_s7 }
  0x13   :  { %125 = vrot.lane.b32.xlu0 %v1049_v2, %s1007_s8  ;;  %146 = vrot.lane.b32.xlu1 %v1041_v0, %s1008_s9 }
  0x17   :  { %166 = vrot.lane.b32.xlu0 %v1057_v5, %s1009_s10  ;;  %187 = vrot.lane.b32.xlu1 %v918_v1, %s1010_s11 }
  0x1b   :  { %208 = vrot.lane.b32.xlu0 %v1049_v2, %s1011_s12  ;;  %229 = vrot.lane.b32.xlu1 %v1041_v0, %s1012_s13 }
  0x1f   :  { %249 = vrot.lane.b32.xlu0 %v1057_v5, %s1013_s0  ;;  %270 = vrot.lane.b32.xlu1 %v918_v1, %s1014_s14 }
  0x23   :  { %291 = vrot.lane.b32.xlu0 %v1049_v2, %s1015_s15  ;;  %312 = vrot.lane.b32.xlu1 %v1041_v0, %s1016_s16 }
  0x27   :  { %332 = vrot.lane.b32.xlu0 %v1057_v5, %s1017_s17  ;;  %353 = vrot.lane.b32.xlu1 %v1049_v2, %s1018_s18 }
  0x2b   :  { %374 = vrot.lane.b32.xlu0 %v1041_v0, %s1019_s19  ;;  %394 = vrot.lane.b32.xlu1 %v1057_v5, %s1020_s20 }
  0x2f   :  { %415 = vrot.lane.b32.xlu0 %v1049_v2, %s1021_s21  ;;  %436 = vrot.lane.b32.xlu1 %v1041_v0, %s1022_s22 }
  0x33   :  { %456 = vrot.lane.b32.xlu0 %v1057_v5, %s1023_s23  ;;  %477 = vrot.lane.b32.xlu1 %v1049_v2, %s1024_s24 }
  0x37   :  { %498 = vrot.lane.b32.xlu0 %v1041_v0, %s1025_s25  ;;  %518 = vrot.lane.b32.xlu1 %v1057_v5, %s1026_s26 }
  0x3b   :  { %539 = vrot.lane.b32.xlu0 %v1049_v2, %s1027_s27 }
  0x75   :  { %v565_v7 = vpop.permute.xlu0 %564   ;;  %v648_v8 = vpop.permute.xlu1 %647  }
  0x76   :  { %919 = vst.msk [vmem:[%s2132_s1 + $0x1a] sm:$0x1] %vm566_vm4, %v565_v7   ;;  %920 = vst.msk [vmem:[%s2132_s1 + $0x39] sm:$0x2] %vm566_vm4, %v565_v7  }
  0x77   :  { %921 = vst.msk [vmem:[%s2132_s1 + $0x58] sm:$0x4] %vm566_vm4, %v565_v7   ;;  %922 = vst.msk [vmem:[%s2132_s1 + $0x77] sm:$0x8] %vm566_vm4, %v565_v7  }
  0x78   :  { %923 = vst.msk [vmem:[%s2132_s1 + $0x96] sm:$0x10] %vm566_vm4, %v565_v7   ;;  %924 = vst.msk [vmem:[%s2132_s1 + $0xb5] sm:$0x20] %vm566_vm4, %v565_v7  }
  0x79   :  { %925 = vst.msk [vmem:[%s2132_s1 + $0xd4] sm:$0x40] %vm566_vm4, %v565_v7   ;;  %926 = vst.msk [vmem:[%s2132_s1 + $0xf3] sm:$0x80] %vm566_vm4, %v565_v7   ;;  %v606_v9 = vpop.permute.xlu0 %605   ;;  %v22_v10 = vpop.permute.xlu1 %21  }
  0x7a   :  { %954 = vst.msk [vmem:[%s2132_s1 + $0x12] sm:$0x1] %vm649_vm5, %v648_v8   ;;  %955 = vst.msk [vmem:[%s2132_s1 + $0x31] sm:$0x2] %vm649_vm5, %v648_v8  }
  0x7b   :  { %956 = vst.msk [vmem:[%s2132_s1 + $0x50] sm:$0x4] %vm649_vm5, %v648_v8   ;;  %957 = vst.msk [vmem:[%s2132_s1 + $0x6f] sm:$0x8] %vm649_vm5, %v648_v8  }
  0x7c   :  { %958 = vst.msk [vmem:[%s2132_s1 + $0x8e] sm:$0x10] %vm649_vm5, %v648_v8   ;;  %959 = vst.msk [vmem:[%s2132_s1 + $0xad] sm:$0x20] %vm649_vm5, %v648_v8  }
  0x7d   :  { %960 = vst.msk [vmem:[%s2132_s1 + $0xcc] sm:$0x40] %vm649_vm5, %v648_v8   ;;  %961 = vst.msk [vmem:[%s2132_s1 + $0xeb] sm:$0x80] %vm649_vm5, %v648_v8   ;;  %v43_v11 = vpop.permute.xlu0 %42   ;;  %v64_v12 = vpop.permute.xlu1 %63  }
  0x7e   :  { %927 = vst.msk [vmem:[%s2132_s1 + $0x1a] sm:$0x1] %vm583_vm6, %v565_v7   ;;  %928 = vst.msk [vmem:[%s2132_s1 + $0x39] sm:$0x2] %vm583_vm6, %v565_v7  }
  0x7f   :  { %929 = vst.msk [vmem:[%s2132_s1 + $0x58] sm:$0x4] %vm583_vm6, %v565_v7   ;;  %930 = vst.msk [vmem:[%s2132_s1 + $0x77] sm:$0x8] %vm583_vm6, %v565_v7  }
  0x80   :  { %931 = vst.msk [vmem:[%s2132_s1 + $0x96] sm:$0x10] %vm583_vm6, %v565_v7   ;;  %932 = vst.msk [vmem:[%s2132_s1 + $0xb5] sm:$0x20] %vm583_vm6, %v565_v7  }
  0x81   :  { %933 = vst.msk [vmem:[%s2132_s1 + $0xd4] sm:$0x40] %vm583_vm6, %v565_v7   ;;  %934 = vst.msk [vmem:[%s2132_s1 + $0xf3] sm:$0x80] %vm583_vm6, %v565_v7   ;;  %v84_v13 = vpop.permute.xlu0 %83   ;;  %v105_v14 = vpop.permute.xlu1 %104  }
  0x82   :  { %962 = vst.msk [vmem:[%s2132_s1 + $0x12] sm:$0x1] %vm666_vm7, %v648_v8   ;;  %963 = vst.msk [vmem:[%s2132_s1 + $0x31] sm:$0x2] %vm666_vm7, %v648_v8  }
  0x83   :  { %964 = vst.msk [vmem:[%s2132_s1 + $0x50] sm:$0x4] %vm666_vm7, %v648_v8   ;;  %965 = vst.msk [vmem:[%s2132_s1 + $0x6f] sm:$0x8] %vm666_vm7, %v648_v8  }
  0x84   :  { %966 = vst.msk [vmem:[%s2132_s1 + $0x8e] sm:$0x10] %vm666_vm7, %v648_v8   ;;  %967 = vst.msk [vmem:[%s2132_s1 + $0xad] sm:$0x20] %vm666_vm7, %v648_v8  }
  0x85   :  { %968 = vst.msk [vmem:[%s2132_s1 + $0xcc] sm:$0x40] %vm666_vm7, %v648_v8   ;;  %969 = vst.msk [vmem:[%s2132_s1 + $0xeb] sm:$0x80] %vm666_vm7, %v648_v8   ;;  %v126_v15 = vpop.permute.xlu0 %125   ;;  %v147_v16 = vpop.permute.xlu1 %146  }
  0x86   :  { %936 = vst.msk [vmem:[%s2132_s1 + $0x8] sm:$0x1] %vm607_vm8, %v606_v9   ;;  %937 = vst.msk [vmem:[%s2132_s1 + $0x27] sm:$0x2] %vm607_vm8, %v606_v9  }
  0x87   :  { %938 = vst.msk [vmem:[%s2132_s1 + $0x46] sm:$0x4] %vm607_vm8, %v606_v9   ;;  %939 = vst.msk [vmem:[%s2132_s1 + $0x65] sm:$0x8] %vm607_vm8, %v606_v9  }
  0x88   :  { %940 = vst.msk [vmem:[%s2132_s1 + $0x84] sm:$0x10] %vm607_vm8, %v606_v9   ;;  %941 = vst.msk [vmem:[%s2132_s1 + $0xa3] sm:$0x20] %vm607_vm8, %v606_v9  }
  0x89   :  { %942 = vst.msk [vmem:[%s2132_s1 + $0xc2] sm:$0x40] %vm607_vm8, %v606_v9   ;;  %943 = vst.msk [vmem:[%s2132_s1 + $0xe1] sm:$0x80] %vm607_vm8, %v606_v9   ;;  %v167_v17 = vpop.permute.xlu0 %166   ;;  %v188_v18 = vpop.permute.xlu1 %187  }
  0x8a   :  { %691 = vst.msk [vmem:[%s2132_s1 + $0x1b] sm:$0x1] %vm3_vm3, %v22_v10   ;;  %692 = vst.msk [vmem:[%s2132_s1 + $0x3a] sm:$0x2] %vm3_vm3, %v22_v10  }
  0x8b   :  { %693 = vst.msk [vmem:[%s2132_s1 + $0x59] sm:$0x4] %vm3_vm3, %v22_v10   ;;  %694 = vst.msk [vmem:[%s2132_s1 + $0x78] sm:$0x8] %vm3_vm3, %v22_v10  }
  0x8c   :  { %695 = vst.msk [vmem:[%s2132_s1 + $0x97] sm:$0x10] %vm3_vm3, %v22_v10   ;;  %696 = vst.msk [vmem:[%s2132_s1 + $0xb6] sm:$0x20] %vm3_vm3, %v22_v10  }
  0x8d   :  { %697 = vst.msk [vmem:[%s2132_s1 + $0xd5] sm:$0x40] %vm3_vm3, %v22_v10   ;;  %698 = vst.msk [vmem:[%s2132_s1 + $0xf4] sm:$0x80] %vm3_vm3, %v22_v10   ;;  %v209_v19 = vpop.permute.xlu0 %208   ;;  %v230_v20 = vpop.permute.xlu1 %229  }
  0x8e   :  { %944 = vst.msk [vmem:[%s2132_s1 + $0x8] sm:$0x1] %vm624_vm9, %v606_v9   ;;  %945 = vst.msk [vmem:[%s2132_s1 + $0x27] sm:$0x2] %vm624_vm9, %v606_v9  }
  0x8f   :  { %946 = vst.msk [vmem:[%s2132_s1 + $0x46] sm:$0x4] %vm624_vm9, %v606_v9   ;;  %947 = vst.msk [vmem:[%s2132_s1 + $0x65] sm:$0x8] %vm624_vm9, %v606_v9  }
  0x90   :  { %948 = vst.msk [vmem:[%s2132_s1 + $0x84] sm:$0x10] %vm624_vm9, %v606_v9   ;;  %949 = vst.msk [vmem:[%s2132_s1 + $0xa3] sm:$0x20] %vm624_vm9, %v606_v9  }
  0x91   :  { %950 = vst.msk [vmem:[%s2132_s1 + $0xc2] sm:$0x40] %vm624_vm9, %v606_v9   ;;  %951 = vst.msk [vmem:[%s2132_s1 + $0xe1] sm:$0x80] %vm624_vm9, %v606_v9   ;;  %v250_v21 = vpop.permute.xlu0 %249   ;;  %v271_v22 = vpop.permute.xlu1 %270  }
  0x92   :  { %700 = vst.msk [vmem:[%s2132_s1 + $0x9] sm:$0x1] %vm3_vm3, %v43_v11   ;;  %701 = vst.msk [vmem:[%s2132_s1 + $0x28] sm:$0x2] %vm3_vm3, %v43_v11  }
  0x93   :  { %702 = vst.msk [vmem:[%s2132_s1 + $0x47] sm:$0x4] %vm3_vm3, %v43_v11   ;;  %703 = vst.msk [vmem:[%s2132_s1 + $0x66] sm:$0x8] %vm3_vm3, %v43_v11  }
  0x94   :  { %704 = vst.msk [vmem:[%s2132_s1 + $0x85] sm:$0x10] %vm3_vm3, %v43_v11   ;;  %705 = vst.msk [vmem:[%s2132_s1 + $0xa4] sm:$0x20] %vm3_vm3, %v43_v11  }
  0x95   :  { %706 = vst.msk [vmem:[%s2132_s1 + $0xc3] sm:$0x40] %vm3_vm3, %v43_v11   ;;  %707 = vst.msk [vmem:[%s2132_s1 + $0xe2] sm:$0x80] %vm3_vm3, %v43_v11   ;;  %v292_v23 = vpop.permute.xlu0 %291   ;;  %v313_v24 = vpop.permute.xlu1 %312  }
  0x96   :  { %709 = vst.msk [vmem:[%s2132_s1 + $0x13] sm:$0x1] %vm3_vm3, %v64_v12   ;;  %710 = vst.msk [vmem:[%s2132_s1 + $0x32] sm:$0x2] %vm3_vm3, %v64_v12  }
  0x97   :  { %711 = vst.msk [vmem:[%s2132_s1 + $0x51] sm:$0x4] %vm3_vm3, %v64_v12   ;;  %712 = vst.msk [vmem:[%s2132_s1 + $0x70] sm:$0x8] %vm3_vm3, %v64_v12  }
  0x98   :  { %713 = vst.msk [vmem:[%s2132_s1 + $0x8f] sm:$0x10] %vm3_vm3, %v64_v12   ;;  %714 = vst.msk [vmem:[%s2132_s1 + $0xae] sm:$0x20] %vm3_vm3, %v64_v12  }
  0x99   :  { %715 = vst.msk [vmem:[%s2132_s1 + $0xcd] sm:$0x40] %vm3_vm3, %v64_v12   ;;  %716 = vst.msk [vmem:[%s2132_s1 + $0xec] sm:$0x80] %vm3_vm3, %v64_v12   ;;  %v333_v25 = vpop.permute.xlu0 %332   ;;  %v354_v26 = vpop.permute.xlu1 %353  }
  0x9a   :  { %717 = vst.msk [vmem:[%s2132_s1 + $0x1] sm:$0x1] %vm3_vm3, %v84_v13   ;;  %718 = vst.msk [vmem:[%s2132_s1 + $0x20] sm:$0x2] %vm3_vm3, %v84_v13  }
  0x9b   :  { %719 = vst.msk [vmem:[%s2132_s1 + $0x3f] sm:$0x4] %vm3_vm3, %v84_v13   ;;  %720 = vst.msk [vmem:[%s2132_s1 + $0x5e] sm:$0x8] %vm3_vm3, %v84_v13  }
  0x9c   :  { %721 = vst.msk [vmem:[%s2132_s1 + $0x7d] sm:$0x10] %vm3_vm3, %v84_v13   ;;  %722 = vst.msk [vmem:[%s2132_s1 + $0x9c] sm:$0x20] %vm3_vm3, %v84_v13  }
  0x9d   :  { %723 = vst.msk [vmem:[%s2132_s1 + $0xbb] sm:$0x40] %vm3_vm3, %v84_v13   ;;  %724 = vst.msk [vmem:[%s2132_s1 + $0xda] sm:$0x80] %vm3_vm3, %v84_v13   ;;  %v375_v27 = vpop.permute.xlu0 %374   ;;  %v395_v28 = vpop.permute.xlu1 %394  }
  0x9e   :  { %726 = vst.msk [vmem:[%s2132_s1 + $0x1c] sm:$0x1] %vm3_vm3, %v105_v14   ;;  %727 = vst.msk [vmem:[%s2132_s1 + $0x3b] sm:$0x2] %vm3_vm3, %v105_v14  }
  0x9f   :  { %728 = vst.msk [vmem:[%s2132_s1 + $0x5a] sm:$0x4] %vm3_vm3, %v105_v14   ;;  %729 = vst.msk [vmem:[%s2132_s1 + $0x79] sm:$0x8] %vm3_vm3, %v105_v14  }
  0xa0   :  { %730 = vst.msk [vmem:[%s2132_s1 + $0x98] sm:$0x10] %vm3_vm3, %v105_v14   ;;  %731 = vst.msk [vmem:[%s2132_s1 + $0xb7] sm:$0x20] %vm3_vm3, %v105_v14  }
  0xa1   :  { %732 = vst.msk [vmem:[%s2132_s1 + $0xd6] sm:$0x40] %vm3_vm3, %v105_v14   ;;  %733 = vst.msk [vmem:[%s2132_s1 + $0xf5] sm:$0x80] %vm3_vm3, %v105_v14   ;;  %v416_v29 = vpop.permute.xlu0 %415   ;;  %v437_v30 = vpop.permute.xlu1 %436  }
  0xa2   :  { %735 = vst.msk [vmem:[%s2132_s1 + $0xa] sm:$0x1] %vm3_vm3, %v126_v15   ;;  %736 = vst.msk [vmem:[%s2132_s1 + $0x29] sm:$0x2] %vm3_vm3, %v126_v15  }
  0xa3   :  { %737 = vst.msk [vmem:[%s2132_s1 + $0x48] sm:$0x4] %vm3_vm3, %v126_v15   ;;  %738 = vst.msk [vmem:[%s2132_s1 + $0x67] sm:$0x8] %vm3_vm3, %v126_v15  }
  0xa4   :  { %739 = vst.msk [vmem:[%s2132_s1 + $0x86] sm:$0x10] %vm3_vm3, %v126_v15   ;;  %740 = vst.msk [vmem:[%s2132_s1 + $0xa5] sm:$0x20] %vm3_vm3, %v126_v15  }
  0xa5   :  { %741 = vst.msk [vmem:[%s2132_s1 + $0xc4] sm:$0x40] %vm3_vm3, %v126_v15   ;;  %742 = vst.msk [vmem:[%s2132_s1 + $0xe3] sm:$0x80] %vm3_vm3, %v126_v15   ;;  %v457_v31 = vpop.permute.xlu0 %456   ;;  %v478_v32 = vpop.permute.xlu1 %477  }
  0xa6   :  { %744 = vst.msk [vmem:[%s2132_s1 + $0x14] sm:$0x1] %vm3_vm3, %v147_v16   ;;  %745 = vst.msk [vmem:[%s2132_s1 + $0x33] sm:$0x2] %vm3_vm3, %v147_v16  }
  0xa7   :  { %746 = vst.msk [vmem:[%s2132_s1 + $0x52] sm:$0x4] %vm3_vm3, %v147_v16   ;;  %747 = vst.msk [vmem:[%s2132_s1 + $0x71] sm:$0x8] %vm3_vm3, %v147_v16  }
  0xa8   :  { %748 = vst.msk [vmem:[%s2132_s1 + $0x90] sm:$0x10] %vm3_vm3, %v147_v16   ;;  %749 = vst.msk [vmem:[%s2132_s1 + $0xaf] sm:$0x20] %vm3_vm3, %v147_v16  }
  0xa9   :  { %750 = vst.msk [vmem:[%s2132_s1 + $0xce] sm:$0x40] %vm3_vm3, %v147_v16   ;;  %751 = vst.msk [vmem:[%s2132_s1 + $0xed] sm:$0x80] %vm3_vm3, %v147_v16   ;;  %v499_v33 = vpop.permute.xlu0 %498   ;;  %v519_v34 = vpop.permute.xlu1 %518  }
  0xaa   :  { %752 = vst.msk [vmem:[%s2132_s1 + $0x2] sm:$0x1] %vm3_vm3, %v167_v17   ;;  %753 = vst.msk [vmem:[%s2132_s1 + $0x21] sm:$0x2] %vm3_vm3, %v167_v17  }
  0xab   :  { %754 = vst.msk [vmem:[%s2132_s1 + $0x40] sm:$0x4] %vm3_vm3, %v167_v17   ;;  %755 = vst.msk [vmem:[%s2132_s1 + $0x5f] sm:$0x8] %vm3_vm3, %v167_v17  }
  0xac   :  { %756 = vst.msk [vmem:[%s2132_s1 + $0x7e] sm:$0x10] %vm3_vm3, %v167_v17   ;;  %757 = vst.msk [vmem:[%s2132_s1 + $0x9d] sm:$0x20] %vm3_vm3, %v167_v17  }
  0xad   :  { %758 = vst.msk [vmem:[%s2132_s1 + $0xbc] sm:$0x40] %vm3_vm3, %v167_v17   ;;  %759 = vst.msk [vmem:[%s2132_s1 + $0xdb] sm:$0x80] %vm3_vm3, %v167_v17   ;;  %v540_v35 = vpop.permute.xlu0 %539  }
  0xae   :  { %761 = vst.msk [vmem:[%s2132_s1 + $0x1d] sm:$0x1] %vm3_vm3, %v188_v18   ;;  %762 = vst.msk [vmem:[%s2132_s1 + $0x3c] sm:$0x2] %vm3_vm3, %v188_v18  }
  0xaf   :  { %763 = vst.msk [vmem:[%s2132_s1 + $0x5b] sm:$0x4] %vm3_vm3, %v188_v18   ;;  %764 = vst.msk [vmem:[%s2132_s1 + $0x7a] sm:$0x8] %vm3_vm3, %v188_v18  }
  0xb0   :  { %765 = vst.msk [vmem:[%s2132_s1 + $0x99] sm:$0x10] %vm3_vm3, %v188_v18   ;;  %766 = vst.msk [vmem:[%s2132_s1 + $0xb8] sm:$0x20] %vm3_vm3, %v188_v18  }
  0xb1   :  { %767 = vst.msk [vmem:[%s2132_s1 + $0xd7] sm:$0x40] %vm3_vm3, %v188_v18   ;;  %768 = vst.msk [vmem:[%s2132_s1 + $0xf6] sm:$0x80] %vm3_vm3, %v188_v18  }
  0xb2   :  { %770 = vst.msk [vmem:[%s2132_s1 + $0xb] sm:$0x1] %vm3_vm3, %v209_v19   ;;  %771 = vst.msk [vmem:[%s2132_s1 + $0x2a] sm:$0x2] %vm3_vm3, %v209_v19  }
  0xb3   :  { %772 = vst.msk [vmem:[%s2132_s1 + $0x49] sm:$0x4] %vm3_vm3, %v209_v19   ;;  %773 = vst.msk [vmem:[%s2132_s1 + $0x68] sm:$0x8] %vm3_vm3, %v209_v19  }
  0xb4   :  { %774 = vst.msk [vmem:[%s2132_s1 + $0x87] sm:$0x10] %vm3_vm3, %v209_v19   ;;  %775 = vst.msk [vmem:[%s2132_s1 + $0xa6] sm:$0x20] %vm3_vm3, %v209_v19  }
  0xb5   :  { %776 = vst.msk [vmem:[%s2132_s1 + $0xc5] sm:$0x40] %vm3_vm3, %v209_v19   ;;  %777 = vst.msk [vmem:[%s2132_s1 + $0xe4] sm:$0x80] %vm3_vm3, %v209_v19  }
  0xb6   :  { %779 = vst.msk [vmem:[%s2132_s1 + $0x15] sm:$0x1] %vm3_vm3, %v230_v20   ;;  %780 = vst.msk [vmem:[%s2132_s1 + $0x34] sm:$0x2] %vm3_vm3, %v230_v20  }
  0xb7   :  { %781 = vst.msk [vmem:[%s2132_s1 + $0x53] sm:$0x4] %vm3_vm3, %v230_v20   ;;  %782 = vst.msk [vmem:[%s2132_s1 + $0x72] sm:$0x8] %vm3_vm3, %v230_v20  }
  0xb8   :  { %783 = vst.msk [vmem:[%s2132_s1 + $0x91] sm:$0x10] %vm3_vm3, %v230_v20   ;;  %784 = vst.msk [vmem:[%s2132_s1 + $0xb0] sm:$0x20] %vm3_vm3, %v230_v20  }
  0xb9   :  { %785 = vst.msk [vmem:[%s2132_s1 + $0xcf] sm:$0x40] %vm3_vm3, %v230_v20   ;;  %786 = vst.msk [vmem:[%s2132_s1 + $0xee] sm:$0x80] %vm3_vm3, %v230_v20  }
  0xba   :  { %787 = vst.msk [vmem:[%s2132_s1 + $0x3] sm:$0x1] %vm3_vm3, %v250_v21   ;;  %788 = vst.msk [vmem:[%s2132_s1 + $0x22] sm:$0x2] %vm3_vm3, %v250_v21  }
  0xbb   :  { %789 = vst.msk [vmem:[%s2132_s1 + $0x41] sm:$0x4] %vm3_vm3, %v250_v21   ;;  %790 = vst.msk [vmem:[%s2132_s1 + $0x60] sm:$0x8] %vm3_vm3, %v250_v21  }
  0xbc   :  { %791 = vst.msk [vmem:[%s2132_s1 + $0x7f] sm:$0x10] %vm3_vm3, %v250_v21   ;;  %792 = vst.msk [vmem:[%s2132_s1 + $0x9e] sm:$0x20] %vm3_vm3, %v250_v21  }
  0xbd   :  { %793 = vst.msk [vmem:[%s2132_s1 + $0xbd] sm:$0x40] %vm3_vm3, %v250_v21   ;;  %794 = vst.msk [vmem:[%s2132_s1 + $0xdc] sm:$0x80] %vm3_vm3, %v250_v21  }
  0xbe   :  { %796 = vst.msk [vmem:[%s2132_s1 + $0x1e] sm:$0x1] %vm3_vm3, %v271_v22   ;;  %797 = vst.msk [vmem:[%s2132_s1 + $0x3d] sm:$0x2] %vm3_vm3, %v271_v22  }
  0xbf   :  { %798 = vst.msk [vmem:[%s2132_s1 + $0x5c] sm:$0x4] %vm3_vm3, %v271_v22   ;;  %799 = vst.msk [vmem:[%s2132_s1 + $0x7b] sm:$0x8] %vm3_vm3, %v271_v22  }
  0xc0   :  { %800 = vst.msk [vmem:[%s2132_s1 + $0x9a] sm:$0x10] %vm3_vm3, %v271_v22   ;;  %801 = vst.msk [vmem:[%s2132_s1 + $0xb9] sm:$0x20] %vm3_vm3, %v271_v22  }
  0xc1   :  { %802 = vst.msk [vmem:[%s2132_s1 + $0xd8] sm:$0x40] %vm3_vm3, %v271_v22   ;;  %803 = vst.msk [vmem:[%s2132_s1 + $0xf7] sm:$0x80] %vm3_vm3, %v271_v22  }
  0xc2   :  { %805 = vst.msk [vmem:[%s2132_s1 + $0xc] sm:$0x1] %vm3_vm3, %v292_v23   ;;  %806 = vst.msk [vmem:[%s2132_s1 + $0x2b] sm:$0x2] %vm3_vm3, %v292_v23  }
  0xc3   :  { %807 = vst.msk [vmem:[%s2132_s1 + $0x4a] sm:$0x4] %vm3_vm3, %v292_v23   ;;  %808 = vst.msk [vmem:[%s2132_s1 + $0x69] sm:$0x8] %vm3_vm3, %v292_v23  }
  0xc4   :  { %809 = vst.msk [vmem:[%s2132_s1 + $0x88] sm:$0x10] %vm3_vm3, %v292_v23   ;;  %810 = vst.msk [vmem:[%s2132_s1 + $0xa7] sm:$0x20] %vm3_vm3, %v292_v23  }
  0xc5   :  { %811 = vst.msk [vmem:[%s2132_s1 + $0xc6] sm:$0x40] %vm3_vm3, %v292_v23   ;;  %812 = vst.msk [vmem:[%s2132_s1 + $0xe5] sm:$0x80] %vm3_vm3, %v292_v23  }
  0xc6   :  { %814 = vst.msk [vmem:[%s2132_s1 + $0x16] sm:$0x1] %vm3_vm3, %v313_v24   ;;  %815 = vst.msk [vmem:[%s2132_s1 + $0x35] sm:$0x2] %vm3_vm3, %v313_v24  }
  0xc7   :  { %816 = vst.msk [vmem:[%s2132_s1 + $0x54] sm:$0x4] %vm3_vm3, %v313_v24   ;;  %817 = vst.msk [vmem:[%s2132_s1 + $0x73] sm:$0x8] %vm3_vm3, %v313_v24  }
  0xc8   :  { %818 = vst.msk [vmem:[%s2132_s1 + $0x92] sm:$0x10] %vm3_vm3, %v313_v24   ;;  %819 = vst.msk [vmem:[%s2132_s1 + $0xb1] sm:$0x20] %vm3_vm3, %v313_v24  }
  0xc9   :  { %820 = vst.msk [vmem:[%s2132_s1 + $0xd0] sm:$0x40] %vm3_vm3, %v313_v24   ;;  %821 = vst.msk [vmem:[%s2132_s1 + $0xef] sm:$0x80] %vm3_vm3, %v313_v24  }
  0xca   :  { %822 = vst.msk [vmem:[%s2132_s1 + $0x4] sm:$0x1] %vm3_vm3, %v333_v25   ;;  %823 = vst.msk [vmem:[%s2132_s1 + $0x23] sm:$0x2] %vm3_vm3, %v333_v25  }
  0xcb   :  { %824 = vst.msk [vmem:[%s2132_s1 + $0x42] sm:$0x4] %vm3_vm3, %v333_v25   ;;  %825 = vst.msk [vmem:[%s2132_s1 + $0x61] sm:$0x8] %vm3_vm3, %v333_v25  }
  0xcc   :  { %826 = vst.msk [vmem:[%s2132_s1 + $0x80] sm:$0x10] %vm3_vm3, %v333_v25   ;;  %827 = vst.msk [vmem:[%s2132_s1 + $0x9f] sm:$0x20] %vm3_vm3, %v333_v25  }
  0xcd   :  { %828 = vst.msk [vmem:[%s2132_s1 + $0xbe] sm:$0x40] %vm3_vm3, %v333_v25   ;;  %829 = vst.msk [vmem:[%s2132_s1 + $0xdd] sm:$0x80] %vm3_vm3, %v333_v25  }
  0xce   :  { %831 = vst.msk [vmem:[%s2132_s1 + $0xd] sm:$0x1] %vm3_vm3, %v354_v26   ;;  %832 = vst.msk [vmem:[%s2132_s1 + $0x2c] sm:$0x2] %vm3_vm3, %v354_v26  }
  0xcf   :  { %833 = vst.msk [vmem:[%s2132_s1 + $0x4b] sm:$0x4] %vm3_vm3, %v354_v26   ;;  %834 = vst.msk [vmem:[%s2132_s1 + $0x6a] sm:$0x8] %vm3_vm3, %v354_v26  }
  0xd0   :  { %835 = vst.msk [vmem:[%s2132_s1 + $0x89] sm:$0x10] %vm3_vm3, %v354_v26   ;;  %836 = vst.msk [vmem:[%s2132_s1 + $0xa8] sm:$0x20] %vm3_vm3, %v354_v26  }
  0xd1   :  { %837 = vst.msk [vmem:[%s2132_s1 + $0xc7] sm:$0x40] %vm3_vm3, %v354_v26   ;;  %838 = vst.msk [vmem:[%s2132_s1 + $0xe6] sm:$0x80] %vm3_vm3, %v354_v26  }
  0xd2   :  { %840 = vst.msk [vmem:[%s2132_s1 + $0x17] sm:$0x1] %vm3_vm3, %v375_v27   ;;  %841 = vst.msk [vmem:[%s2132_s1 + $0x36] sm:$0x2] %vm3_vm3, %v375_v27  }
  0xd3   :  { %842 = vst.msk [vmem:[%s2132_s1 + $0x55] sm:$0x4] %vm3_vm3, %v375_v27   ;;  %843 = vst.msk [vmem:[%s2132_s1 + $0x74] sm:$0x8] %vm3_vm3, %v375_v27  }
  0xd4   :  { %844 = vst.msk [vmem:[%s2132_s1 + $0x93] sm:$0x10] %vm3_vm3, %v375_v27   ;;  %845 = vst.msk [vmem:[%s2132_s1 + $0xb2] sm:$0x20] %vm3_vm3, %v375_v27  }
  0xd5   :  { %846 = vst.msk [vmem:[%s2132_s1 + $0xd1] sm:$0x40] %vm3_vm3, %v375_v27   ;;  %847 = vst.msk [vmem:[%s2132_s1 + $0xf0] sm:$0x80] %vm3_vm3, %v375_v27  }
  0xd6   :  { %848 = vst.msk [vmem:[%s2132_s1 + $0x5] sm:$0x1] %vm3_vm3, %v395_v28   ;;  %849 = vst.msk [vmem:[%s2132_s1 + $0x24] sm:$0x2] %vm3_vm3, %v395_v28  }
  0xd7   :  { %850 = vst.msk [vmem:[%s2132_s1 + $0x43] sm:$0x4] %vm3_vm3, %v395_v28   ;;  %851 = vst.msk [vmem:[%s2132_s1 + $0x62] sm:$0x8] %vm3_vm3, %v395_v28  }
  0xd8   :  { %852 = vst.msk [vmem:[%s2132_s1 + $0x81] sm:$0x10] %vm3_vm3, %v395_v28   ;;  %853 = vst.msk [vmem:[%s2132_s1 + $0xa0] sm:$0x20] %vm3_vm3, %v395_v28  }
  0xd9   :  { %854 = vst.msk [vmem:[%s2132_s1 + $0xbf] sm:$0x40] %vm3_vm3, %v395_v28   ;;  %855 = vst.msk [vmem:[%s2132_s1 + $0xde] sm:$0x80] %vm3_vm3, %v395_v28  }
  0xda   :  { %857 = vst.msk [vmem:[%s2132_s1 + $0xe] sm:$0x1] %vm3_vm3, %v416_v29   ;;  %858 = vst.msk [vmem:[%s2132_s1 + $0x2d] sm:$0x2] %vm3_vm3, %v416_v29  }
  0xdb   :  { %859 = vst.msk [vmem:[%s2132_s1 + $0x4c] sm:$0x4] %vm3_vm3, %v416_v29   ;;  %860 = vst.msk [vmem:[%s2132_s1 + $0x6b] sm:$0x8] %vm3_vm3, %v416_v29  }
  0xdc   :  { %861 = vst.msk [vmem:[%s2132_s1 + $0x8a] sm:$0x10] %vm3_vm3, %v416_v29   ;;  %862 = vst.msk [vmem:[%s2132_s1 + $0xa9] sm:$0x20] %vm3_vm3, %v416_v29  }
  0xdd   :  { %863 = vst.msk [vmem:[%s2132_s1 + $0xc8] sm:$0x40] %vm3_vm3, %v416_v29   ;;  %864 = vst.msk [vmem:[%s2132_s1 + $0xe7] sm:$0x80] %vm3_vm3, %v416_v29  }
  0xde   :  { %866 = vst.msk [vmem:[%s2132_s1 + $0x18] sm:$0x1] %vm3_vm3, %v437_v30   ;;  %867 = vst.msk [vmem:[%s2132_s1 + $0x37] sm:$0x2] %vm3_vm3, %v437_v30  }
  0xdf   :  { %868 = vst.msk [vmem:[%s2132_s1 + $0x56] sm:$0x4] %vm3_vm3, %v437_v30   ;;  %869 = vst.msk [vmem:[%s2132_s1 + $0x75] sm:$0x8] %vm3_vm3, %v437_v30  }
  0xe0   :  { %870 = vst.msk [vmem:[%s2132_s1 + $0x94] sm:$0x10] %vm3_vm3, %v437_v30   ;;  %871 = vst.msk [vmem:[%s2132_s1 + $0xb3] sm:$0x20] %vm3_vm3, %v437_v30  }
  0xe1   :  { %872 = vst.msk [vmem:[%s2132_s1 + $0xd2] sm:$0x40] %vm3_vm3, %v437_v30   ;;  %873 = vst.msk [vmem:[%s2132_s1 + $0xf1] sm:$0x80] %vm3_vm3, %v437_v30  }
  0xe2   :  { %874 = vst.msk [vmem:[%s2132_s1 + $0x6] sm:$0x1] %vm3_vm3, %v457_v31   ;;  %875 = vst.msk [vmem:[%s2132_s1 + $0x25] sm:$0x2] %vm3_vm3, %v457_v31  }
  0xe3   :  { %876 = vst.msk [vmem:[%s2132_s1 + $0x44] sm:$0x4] %vm3_vm3, %v457_v31   ;;  %877 = vst.msk [vmem:[%s2132_s1 + $0x63] sm:$0x8] %vm3_vm3, %v457_v31  }
  0xe4   :  { %878 = vst.msk [vmem:[%s2132_s1 + $0x82] sm:$0x10] %vm3_vm3, %v457_v31   ;;  %879 = vst.msk [vmem:[%s2132_s1 + $0xa1] sm:$0x20] %vm3_vm3, %v457_v31  }
  0xe5   :  { %880 = vst.msk [vmem:[%s2132_s1 + $0xc0] sm:$0x40] %vm3_vm3, %v457_v31   ;;  %881 = vst.msk [vmem:[%s2132_s1 + $0xdf] sm:$0x80] %vm3_vm3, %v457_v31  }
  0xe6   :  { %883 = vst.msk [vmem:[%s2132_s1 + $0x10] sm:$0x1] %vm3_vm3, %v478_v32   ;;  %884 = vst.msk [vmem:[%s2132_s1 + $0x2f] sm:$0x2] %vm3_vm3, %v478_v32  }
  0xe7   :  { %885 = vst.msk [vmem:[%s2132_s1 + $0x4e] sm:$0x4] %vm3_vm3, %v478_v32   ;;  %886 = vst.msk [vmem:[%s2132_s1 + $0x6d] sm:$0x8] %vm3_vm3, %v478_v32  }
  0xe8   :  { %887 = vst.msk [vmem:[%s2132_s1 + $0x8c] sm:$0x10] %vm3_vm3, %v478_v32   ;;  %888 = vst.msk [vmem:[%s2132_s1 + $0xab] sm:$0x20] %vm3_vm3, %v478_v32  }
  0xe9   :  { %889 = vst.msk [vmem:[%s2132_s1 + $0xca] sm:$0x40] %vm3_vm3, %v478_v32   ;;  %890 = vst.msk [vmem:[%s2132_s1 + $0xe9] sm:$0x80] %vm3_vm3, %v478_v32  }
  0xea   :  { %892 = vst.msk [vmem:[%s2132_s1 + $0x19] sm:$0x1] %vm3_vm3, %v499_v33   ;;  %893 = vst.msk [vmem:[%s2132_s1 + $0x38] sm:$0x2] %vm3_vm3, %v499_v33  }
  0xeb   :  { %894 = vst.msk [vmem:[%s2132_s1 + $0x57] sm:$0x4] %vm3_vm3, %v499_v33   ;;  %895 = vst.msk [vmem:[%s2132_s1 + $0x76] sm:$0x8] %vm3_vm3, %v499_v33  }
  0xec   :  { %896 = vst.msk [vmem:[%s2132_s1 + $0x95] sm:$0x10] %vm3_vm3, %v499_v33   ;;  %897 = vst.msk [vmem:[%s2132_s1 + $0xb4] sm:$0x20] %vm3_vm3, %v499_v33  }
  0xed   :  { %898 = vst.msk [vmem:[%s2132_s1 + $0xd3] sm:$0x40] %vm3_vm3, %v499_v33   ;;  %899 = vst.msk [vmem:[%s2132_s1 + $0xf2] sm:$0x80] %vm3_vm3, %v499_v33  }
  0xee   :  { %900 = vst.msk [vmem:[%s2132_s1 + $0x7] sm:$0x1] %vm3_vm3, %v519_v34   ;;  %901 = vst.msk [vmem:[%s2132_s1 + $0x26] sm:$0x2] %vm3_vm3, %v519_v34  }
  0xef   :  { %902 = vst.msk [vmem:[%s2132_s1 + $0x45] sm:$0x4] %vm3_vm3, %v519_v34   ;;  %903 = vst.msk [vmem:[%s2132_s1 + $0x64] sm:$0x8] %vm3_vm3, %v519_v34  }
  0xf0   :  { %904 = vst.msk [vmem:[%s2132_s1 + $0x83] sm:$0x10] %vm3_vm3, %v519_v34   ;;  %905 = vst.msk [vmem:[%s2132_s1 + $0xa2] sm:$0x20] %vm3_vm3, %v519_v34  }
  0xf1   :  { %906 = vst.msk [vmem:[%s2132_s1 + $0xc1] sm:$0x40] %vm3_vm3, %v519_v34   ;;  %907 = vst.msk [vmem:[%s2132_s1 + $0xe0] sm:$0x80] %vm3_vm3, %v519_v34  }
  0xf2   :  { %909 = vst.msk [vmem:[%s2132_s1 + $0x11] sm:$0x1] %vm3_vm3, %v540_v35   ;;  %910 = vst.msk [vmem:[%s2132_s1 + $0x30] sm:$0x2] %vm3_vm3, %v540_v35  }
  0xf3   :  { %911 = vst.msk [vmem:[%s2132_s1 + $0x4f] sm:$0x4] %vm3_vm3, %v540_v35   ;;  %912 = vst.msk [vmem:[%s2132_s1 + $0x6e] sm:$0x8] %vm3_vm3, %v540_v35  }
  0xf4   :  { %913 = vst.msk [vmem:[%s2132_s1 + $0x8d] sm:$0x10] %vm3_vm3, %v540_v35   ;;  %914 = vst.msk [vmem:[%s2132_s1 + $0xac] sm:$0x20] %vm3_vm3, %v540_v35  }
  0xf5   :  { %915 = vst.msk [vmem:[%s2132_s1 + $0xcb] sm:$0x40] %vm3_vm3, %v540_v35   ;;  %916 = vst.msk [vmem:[%s2132_s1 + $0xea] sm:$0x80] %vm3_vm3, %v540_v35  }

// kernel: trans_conv_layer.3
= control target key start
LH: loop header
LB: loop body
LE: loop exit
PB: predicated region body
PF: predicated region fallthrough
CT: control target
= control target key end

     0   :  { %s557_s12 = smov 0   ;;  %s559_s13 = smov 0   ;;  %s750_s0 = inlined_call_operand.vmem [shape: f32[4,512,128], index: 0, kind: input, shape index: {}]   ;;  %s751_s1 = inlined_call_operand.vmem [shape: f32[1,128], index: 1, kind: input, shape index: {}]   ;;  %s752_s2 = inlined_call_operand.vmem [shape: f32[1,128], index: 2, kind: input, shape index: {}]   ;;  %s753_s3 = inlined_call_operand.vmem [shape: f32[4,512,128], index: 3, kind: output, shape index: {}]  }
   0x1   :  { %s561_s14 = smov 0   ;;  %s563_s15 = smov 0  }
   0x2   :  { %s565_s16 = smov 0  }
   0x3 LB: > { %s22_s17 = sadd.s32 1, %s527_s14  ;;  %s25_s18 = sadd.s32 1, %s531_s15  ;;  %s535_s16 = sphi %s565_s16, %s13_s16   ;;  %s531_s15 = sphi %s563_s15, %s757_s15   ;;  %s527_s14 = sphi %s561_s14, %s756_s14   ;;  %s523_s13 = sphi %s559_s13, %s755_s13   ;;  %s519_s12 = sphi %s557_s12, %s754_s12  }
   0x4   : > { %p23_p0 = scmp.ge.s32.totalorder %s22_s17, 2  ;;  %p446_p1 = scmp.ge.s32.totalorder %s535_s16, 1 }
   0x5   : > { %p158_p2 = scmp.lt.s32.totalorder %s535_s16, 9 }
   0x6   : > { %s759_s17 = smov (%p23_p0, %s22_s17), 0  ;;  %s761_s18 = smov (!%p23_p0, %s25_s18), %s531_s15 }
   0x7   : > { %p159_p3 = pnand %p446_p1, %p158_p2  ;;  %p27_p4 = scmp.ge.s32.totalorder %s761_s18, 4 }
   0x8   : > { %s447_s19 = sshll.u32 (!%p159_p3), %s519_s12, 5  ;;  %p191_p5 = scmp.lt.s32.totalorder (!%p159_p3), %s523_s13, 3  ;;  %v590_v0 = vld [vmem:[%s751_s1] ss:$0 sm:$0xff] (!%p159_p3) }
   0x9   : > { %s763_s18 = smov (%p27_p4, %s761_s18), 0  ;;  %162 = sbr.rel (%p159_p3) target bundleno = 45 (0x2d), region = 32 }
   0xa   : > { %p193_p6 = scmp.lt.s32.totalorder (!%p159_p3), %s447_s19, 63  ;;  %v600_v1 = vld [vmem:[%s752_s2] ss:$0 sm:$0xff] (!%p159_p3) }
  0x10   : > { %s765_s13 = smov (!%p191_p5, %s523_s13), 3  ;;  %s767_s19 = smov (!%p193_p6, %s447_s19), 63 }
  0x11   : > { %s448_s20 = sshll.u32 %s765_s13, 6 }
  0x12   : > { %s196_s21 = sadd.s32 %s448_s20, %s767_s19 }
  0x13   : > { %s449_s22 = sshll.u32 %s196_s21, 3 }
  0x14   : > { %s595_s27 = scalar_lea.vmem %s750_s0, %s449_s22  ;;  %s614_s5 = scalar_lea.vmem %s753_s3, %s449_s22 }
  0x15   : > { %v210_v2 = vld [vmem:[%s595_s27] sm:$0xff]  ;;  %v211_v3 = vld [vmem:[%s595_s27 + $0x8] sm:$0xff]  ;;  %v212_v4 = vld [vmem:[%s595_s27 + $0x10] sm:$0xff] }
  0x16   : > { %v249_v5 = vmul.f32 %v590_v0, %v210_v2  ;;  %v250_v6 = vmul.f32 %v590_v0, %v211_v3  ;;  %v251_v7 = vmul.f32 %v590_v0, %v212_v4  ;;  %v213_v8 = vld [vmem:[%s595_s27 + $0x18] sm:$0xff]  ;;  %v214_v9 = vld [vmem:[%s595_s27 + $0x20] sm:$0xff]  ;;  %v215_v10 = vld [vmem:[%s595_s27 + $0x28] sm:$0xff] }
  0x17   : > { %v252_v11 = vmul.f32 %v590_v0, %v213_v8  ;;  %v253_v12 = vmul.f32 %v590_v0, %v214_v9  ;;  %v254_v13 = vmul.f32 %v590_v0, %v215_v10  ;;  %v216_v14 = vld [vmem:[%s595_s27 + $0x30] sm:$0xff]  ;;  %v217_v15 = vld [vmem:[%s595_s27 + $0x38] sm:$0xff]  ;;  %v218_v16 = vld [vmem:[%s595_s27 + $0x40] sm:$0xff] }
  0x18   : > { %v288_v17 = vadd.f32 %v600_v1, %v249_v5  ;;  %v289_v18 = vadd.f32 %v600_v1, %v250_v6  ;;  %v290_v19 = vadd.f32 %v600_v1, %v251_v7  ;;  %v255_v20 = vmul.f32 %v590_v0, %v216_v14  ;;  %v219_v21 = vld [vmem:[%s595_s27 + $0x48] sm:$0xff]  ;;  %v220_v22 = vld [vmem:[%s595_s27 + $0x50] sm:$0xff]  ;;  %v221_v23 = vld [vmem:[%s595_s27 + $0x58] sm:$0xff] }
  0x19   : > { %v291_v24 = vadd.f32 %v600_v1, %v252_v11  ;;  %v292_v25 = vadd.f32 %v600_v1, %v253_v12  ;;  %v293_v26 = vadd.f32 %v600_v1, %v254_v13  ;;  %v256_v27 = vmul.f32 %v590_v0, %v217_v15  ;;  %v222_v28 = vld [vmem:[%s595_s27 + $0x60] sm:$0xff]  ;;  %v223_v29 = vld [vmem:[%s595_s27 + $0x68] sm:$0xff]  ;;  %v224_v30 = vld [vmem:[%s595_s27 + $0x70] sm:$0xff] }
  0x1a   : > { %320 = vst [vmem:[%s614_s5] sm:$0xff] %v288_v17  ;;  %321 = vst [vmem:[%s614_s5 + $0x8] sm:$0xff] %v289_v18  ;;  %v294_v31 = vadd.f32 %v600_v1, %v255_v20  ;;  %v257_v32 = vmul.f32 %v590_v0, %v218_v16  ;;  %v258_v33 = vmul.f32 %v590_v0, %v219_v21  ;;  %v225_v35 = vld [vmem:[%s595_s27 + $0x78] sm:$0xff]  ;;  %v226_v40 = vld [vmem:[%s595_s27 + $0x80] sm:$0xff] }
  0x1b   : > { %322 = vst [vmem:[%s614_s5 + $0x10] sm:$0xff] %v290_v19  ;;  %v259_v34 = vmul.f32 %v590_v0, %v220_v22  ;;  %323 = vst [vmem:[%s614_s5 + $0x18] sm:$0xff] %v291_v24  ;;  %v295_v36 = vadd.f32 %v600_v1, %v256_v27  ;;  %v260_v37 = vmul.f32 %v590_v0, %v221_v23  ;;  %v227_v41 = vld [vmem:[%s595_s27 + $0x88] sm:$0xff]  ;;  %v228_v42 = vld [vmem:[%s595_s27 + $0x90] sm:$0xff] }
  0x1c   : > { %324 = vst [vmem:[%s614_s5 + $0x20] sm:$0xff] %v292_v25  ;;  %325 = vst [vmem:[%s614_s5 + $0x28] sm:$0xff] %v293_v26  ;;  %v261_v38 = vmul.f32 %v590_v0, %v222_v28  ;;  %v262_v39 = vmul.f32 %v590_v0, %v223_v29  ;;  %v296_v43 = vadd.f32 %v600_v1, %v257_v32  ;;  %v229_v47 = vld [vmem:[%s595_s27 + $0x98] sm:$0xff]  ;;  %v230_v48 = vld [vmem:[%s595_s27 + $0xa0] sm:$0xff] }
  0x1d   : > { %326 = vst [vmem:[%s614_s5 + $0x30] sm:$0xff] %v294_v31  ;;  %v297_v44 = vadd.f32 %v600_v1, %v258_v33  ;;  %v298_v45 = vadd.f32 %v600_v1, %v259_v34  ;;  %v263_v46 = vmul.f32 %v590_v0, %v224_v30  ;;  %v231_v49 = vld [vmem:[%s595_s27 + $0xa8] sm:$0xff]  ;;  %327 = vst [vmem:[%s614_s5 + $0x38] sm:$0xff] %v295_v36  ;;  %v232_v54 = vld [vmem:[%s595_s27 + $0xb0] sm:$0xff] }
  0x1e   : > { %v299_v50 = vadd.f32 %v600_v1, %v260_v37  ;;  %v300_v51 = vadd.f32 %v600_v1, %v261_v38  ;;  %v301_v52 = vadd.f32 %v600_v1, %v262_v39  ;;  %v264_v53 = vmul.f32 %v590_v0, %v225_v35  ;;  %328 = vst [vmem:[%s614_s5 + $0x40] sm:$0xff] %v296_v43  ;;  %v233_v59 = vld [vmem:[%s595_s27 + $0xb8] sm:$0xff]  ;;  %v234_v2 = vld [vmem:[%s595_s27 + $0xc0] sm:$0xff]  ;;  %v235_v3 = vld [vmem:[%s595_s27 + $0xc8] sm:$0xff] }
  0x1f   : > { %329 = vst [vmem:[%s614_s5 + $0x48] sm:$0xff] %v297_v44  ;;  %330 = vst [vmem:[%s614_s5 + $0x50] sm:$0xff] %v298_v45  ;;  %v302_v55 = vadd.f32 %v600_v1, %v263_v46  ;;  %v265_v56 = vmul.f32 %v590_v0, %v226_v40  ;;  %v266_v57 = vmul.f32 %v590_v0, %v227_v41  ;;  %v236_v4 = vld [vmem:[%s595_s27 + $0xd0] sm:$0xff]  ;;  %v237_v9 = vld [vmem:[%s595_s27 + $0xd8] sm:$0xff] }
  0x20   : > { %v267_v58 = vmul.f32 %v590_v0, %v228_v42  ;;  %331 = vst [vmem:[%s614_s5 + $0x58] sm:$0xff] %v299_v50  ;;  %332 = vst [vmem:[%s614_s5 + $0x60] sm:$0xff] %v300_v51  ;;  %v303_v60 = vadd.f32 %v600_v1, %v264_v53  ;;  %v268_v61 = vmul.f32 %v590_v0, %v229_v47  ;;  %v238_v10 = vld [vmem:[%s595_s27 + $0xe0] sm:$0xff]  ;;  %v239_v11 = vld [vmem:[%s595_s27 + $0xe8] sm:$0xff] }
  0x21   : > { %333 = vst [vmem:[%s614_s5 + $0x68] sm:$0xff] %v301_v52  ;;  %v269_v62 = vmul.f32 %v590_v0, %v230_v48  ;;  %v270_v63 = vmul.f32 %v590_v0, %v231_v49  ;;  %334 = vst [vmem:[%s614_s5 + $0x70] sm:$0xff] %v302_v55  ;;  %v304_v5 = vadd.f32 %v600_v1, %v265_v56  ;;  %v240_v16 = vld [vmem:[%s595_s27 + $0xf0] sm:$0xff]  ;;  %v241_v21 = vld [vmem:[%s595_s27 + $0xf8] sm:$0xff] }
  0x22   : > { %v305_v6 = vadd.f32 %v600_v1, %v266_v57  ;;  %v306_v7 = vadd.f32 %v600_v1, %v267_v58  ;;  %v271_v8 = vmul.f32 %v590_v0, %v232_v54  ;;  %335 = vst [vmem:[%s614_s5 + $0x78] sm:$0xff] %v303_v60  ;;  %v307_v12 = vadd.f32 %v600_v1, %v268_v61 }
  0x23   : > { %v308_v13 = vadd.f32 %v600_v1, %v269_v62  ;;  %v309_v14 = vadd.f32 %v600_v1, %v270_v63  ;;  %v272_v15 = vmul.f32 %v590_v0, %v233_v59  ;;  %336 = vst [vmem:[%s614_s5 + $0x80] sm:$0xff] %v304_v5  ;;  %v273_v18 = vmul.f32 %v590_v0, %v234_v2 }
  0x24   : > { %337 = vst [vmem:[%s614_s5 + $0x88] sm:$0xff] %v305_v6  ;;  %338 = vst [vmem:[%s614_s5 + $0x90] sm:$0xff] %v306_v7  ;;  %v310_v17 = vadd.f32 %v600_v1, %v271_v8  ;;  %v274_v19 = vmul.f32 %v590_v0, %v235_v3  ;;  %v275_v20 = vmul.f32 %v590_v0, %v236_v4 }
  0x25   : > { %339 = vst [vmem:[%s614_s5 + $0x98] sm:$0xff] %v307_v12  ;;  %340 = vst [vmem:[%s614_s5 + $0xa0] sm:$0xff] %v308_v13  ;;  %v311_v22 = vadd.f32 %v600_v1, %v272_v15  ;;  %v276_v23 = vmul.f32 %v590_v0, %v237_v9  ;;  %v277_v24 = vmul.f32 %v590_v0, %v238_v10 }
  0x26   : > { %341 = vst [vmem:[%s614_s5 + $0xa8] sm:$0xff] %v309_v14  ;;  %v278_v25 = vmul.f32 %v590_v0, %v239_v11  ;;  %342 = vst [vmem:[%s614_s5 + $0xb0] sm:$0xff] %v310_v17  ;;  %v312_v26 = vadd.f32 %v600_v1, %v273_v18  ;;  %v313_v27 = vadd.f32 %v600_v1, %v274_v19 }
  0x27   : > { %v314_v28 = vadd.f32 %v600_v1, %v275_v20  ;;  %v279_v29 = vmul.f32 %v590_v0, %v240_v16  ;;  %343 = vst [vmem:[%s614_s5 + $0xb8] sm:$0xff] %v311_v22  ;;  %v315_v30 = vadd.f32 %v600_v1, %v276_v23  ;;  %v316_v31 = vadd.f32 %v600_v1, %v277_v24 }
  0x28   : > { %v317_v32 = vadd.f32 %v600_v1, %v278_v25  ;;  %v280_v33 = vmul.f32 %v590_v0, %v241_v21  ;;  %344 = vst [vmem:[%s614_s5 + $0xc0] sm:$0xff] %v312_v26  ;;  %345 = vst [vmem:[%s614_s5 + $0xc8] sm:$0xff] %v313_v27 }
  0x29   : > { %346 = vst [vmem:[%s614_s5 + $0xd0] sm:$0xff] %v314_v28  ;;  %v318_v34 = vadd.f32 %v600_v1, %v279_v29  ;;  %347 = vst [vmem:[%s614_s5 + $0xd8] sm:$0xff] %v315_v30 }
  0x2a   : > { %348 = vst [vmem:[%s614_s5 + $0xe0] sm:$0xff] %v316_v31  ;;  %349 = vst [vmem:[%s614_s5 + $0xe8] sm:$0xff] %v317_v32  ;;  %v319_v35 = vadd.f32 %v600_v1, %v280_v33 }
  0x2b   : > { %350 = vst [vmem:[%s614_s5 + $0xf0] sm:$0xff] %v318_v34 }
  0x2c   : > { %351 = vst [vmem:[%s614_s5 + $0xf8] sm:$0xff] %v319_v35 }
  0x2d PF: > { %s13_s16 = sadd.s32 1, %s535_s16   ;;  %s754_s12 = smov %s527_s14 }
  0x2e   : > { %p10_p7 = scmp.ge.s32.totalorder %s13_s16, 10   ;;  %s755_s13 = smov %s531_s15 }
  0x2f   : > { %s756_s14 = smov %s759_s17  ;;  %s757_s15 = smov %s763_s18 }
  0x30   :  { %12 = sbr.rel (!%p10_p7) target bundleno = 3 (0x3), region = 62 }

// kernel: trans_conv_layer.2
= control target key start
LH: loop header
LB: loop body
LE: loop exit
PB: predicated region body
PF: predicated region fallthrough
CT: control target
= control target key end

     0   :  { %s1427_s12 = smov 0   ;;  %s1429_s13 = smov 0   ;;  %s1863_s0 = inlined_call_operand.vmem [shape: f32[4,512,16], index: 0, kind: input, shape index: {}]   ;;  %s1864_s1 = inlined_call_operand.vmem [shape: f32[4,16,128], index: 1, kind: input, shape index: {}]   ;;  %s1865_s2 = inlined_call_operand.vmem [shape: f32[4,512,128], index: 2, kind: output, shape index: {0}]   ;;  %s1866_s3 = inlined_call_operand.vmem [shape: f32[4,2,2,128], index: 3, kind: output, shape index: {1}]  }
   0x1   :  { %s1431_s14 = smov 0   ;;  %s1433_s15 = smov 0  }
   0x2   :  { %s1435_s16 = smov 0  }
   0x3 LB: > { %s23_s17 = sadd.s32 1, %s1397_s14  ;;  %s26_s18 = sadd.s32 1, %s1401_s15  ;;  %s1405_s16 = sphi %s1435_s16, %s14_s16   ;;  %s1401_s15 = sphi %s1433_s15, %s1870_s15   ;;  %s1397_s14 = sphi %s1431_s14, %s1869_s14   ;;  %s1393_s13 = sphi %s1429_s13, %s1868_s13   ;;  %s1389_s12 = sphi %s1427_s12, %s1867_s12  }
   0x4   : > { %p24_p0 = scmp.ge.s32.totalorder %s23_s17, 2  ;;  %p1093_p1 = scmp.ge.s32.totalorder %s1405_s16, 1 }
   0x5   : > { %p173_p2 = scmp.lt.s32.totalorder %s1405_s16, 9 }
   0x6   : > { %s1872_s17 = smov (%p24_p0, %s23_s17), 0  ;;  %s1874_s18 = smov (!%p24_p0, %s26_s18), %s1401_s15 }
   0x7   : > { %p174_p3 = pnand %p1093_p1, %p173_p2  ;;  %p28_p4 = scmp.ge.s32.totalorder %s1874_s18, 4 }
   0x8   : > { %s1094_s19 = sshll.u32 (!%p174_p3), %s1389_s12, 5  ;;  %p219_p5 = scmp.lt.s32.totalorder (!%p174_p3), %s1393_s13, 3  ;;  %vm285_vm0 = vcmask (!%p174_p3), 130048  }
   0x9   : > { %s1876_s18 = smov (%p28_p4, %s1874_s18), 0  ;;  %177 = sbr.rel (%p174_p3) target bundleno = 344 (0x158), region = 28 }
   0xa   : > { %p221_p6 = scmp.lt.s32.totalorder (!%p174_p3), %s1094_s19, 63  ;;  %p245_p7 = scmp.lt.s32.totalorder (!%p174_p3), %s1389_s12, 1 }
  0x10   : > { %s1878_s13 = smov (!%p219_p5, %s1393_s13), 3  ;;  %s1880_s19 = smov (!%p221_p6, %s1094_s19), 63 }
  0x11   : > { %s1095_s20 = sshll.u32 %s1878_s13, 6  ;;  %s1170_s21 = sshll.u32 %s1878_s13, 4 }
  0x12   : > { %s1464_s22 = sadd.s32 %s1095_s20, %s1880_s19  ;;  %s232_s25 = scalar_lea.vmem %s1864_s1, %s1170_s21 }
  0x13   : > { %s1096_s26 = sshll.u32 %s1464_s22, 3  ;;  %v283_v0 = vld [vmem:[%s232_s25] sm:$0xff]  ;;  %v284_v1 = vld [vmem:[%s232_s25 + $0x8] sm:$0xff]  ;;  %s1882_s12 = smov (!%p245_p7, %s1389_s12), 1 }
  0x14   : > { %s1475_s29 = scalar_lea.vmem %s1863_s0, %s1096_s26  ;;  %v1257_v2 = vpack.c.bf16 %v284_v1, %v283_v0  ;;  %s1597_s5 = scalar_lea.vmem %s1865_s2, %s1096_s26 }
  0x15   : > { %v251_v3 = vld [vmem:[%s1475_s29] sm:$0xff]  ;;  %v252_v4 = vld [vmem:[%s1475_s29 + $0x8] sm:$0xff]  ;;  %v253_v6 = vld [vmem:[%s1475_s29 + $0x10] sm:$0xff]  ;;  %s1102_s6 = sshll.u32 %s1878_s13, 1 }
  0x16   : > { %1258 = vmatprep.subr.bf16.mxu0 %v1257_v2  ;;  %1209 = vmatprep.mubr.msk.f32.mxu0 %vm285_vm0, %v251_v3  ;;  %v267_v5 = vld [vmem:[%s1475_s29 + $0x80] sm:$0xff]  ;;  %v268_v7 = vld [vmem:[%s1475_s29 + $0x88] sm:$0xff]  ;;  %v269_v8 = vld [vmem:[%s1475_s29 + $0x90] sm:$0xff]  ;;  %s248_s7 = sadd.s32 %s1102_s6, %s1882_s12 }
  0x17   : > { %1260 = vmatpush3.bf16.msra.mxu0 %v1257_v2  ;;  %1261 = vmatprep.subr.bf16.mxu1 %v1257_v2  ;;  %v254_v9 = vld [vmem:[%s1475_s29 + $0x18] sm:$0xff]  ;;  %v255_v10 = vld [vmem:[%s1475_s29 + $0x20] sm:$0xff]  ;;  %v256_v13 = vld [vmem:[%s1475_s29 + $0x28] sm:$0xff]  ;;  %s1103_s8 = sshll.u32 %s248_s7, 1 }
  0x18   : > { %1262 = vmatpush3.bf16.msra.mxu1 %v1257_v2  ;;  %1233 = vmatprep.mubr.msk.f32.mxu1 %vm285_vm0, %v267_v5  ;;  %v270_v11 = vld [vmem:[%s1475_s29 + $0x98] sm:$0xff]  ;;  %v271_v12 = vld [vmem:[%s1475_s29 + $0xa0] sm:$0xff]  ;;  %v257_v14 = vld [vmem:[%s1475_s29 + $0x30] sm:$0xff]  ;;  %s250_s11 = scalar_lea.vmem %s1866_s3, %s1103_s8 }
  0x19   : > { %v272_v15 = vld [vmem:[%s1475_s29 + $0xa8] sm:$0xff]  ;;  %v273_v16 = vld [vmem:[%s1475_s29 + $0xb0] sm:$0xff]  ;;  %v258_v17 = vld [vmem:[%s1475_s29 + $0x38] sm:$0xff] }
  0x1a   : > { %1210 = vmatmul.mubr.msk.f32.vlgmr.msra.gmra.mrb[0].mxu0 %vm285_vm0, %v252_v4  ;;  %v259_v18 = vld [vmem:[%s1475_s29 + $0x40] sm:$0xff]  ;;  %v274_v19 = vld [vmem:[%s1475_s29 + $0xb8] sm:$0xff]  ;;  %v260_v21 = vld [vmem:[%s1475_s29 + $0x48] sm:$0xff] }
  0x1b   : > { %1212 = vmatprep.mubr.msk.f32.mxu0 %vm285_vm0, %v253_v6  ;;  %1234 = vmatmul.mubr.msk.f32.vlgmr.msra.gmra.mrb[0].mxu1 %vm285_vm0, %v268_v7  ;;  %v275_v20 = vld [vmem:[%s1475_s29 + $0xc0] sm:$0xff]  ;;  %v261_v22 = vld [vmem:[%s1475_s29 + $0x50] sm:$0xff]  ;;  %v276_v23 = vld [vmem:[%s1475_s29 + $0xc8] sm:$0xff] }
  0x1c   : > { %1236 = vmatprep.mubr.msk.f32.mxu1 %vm285_vm0, %v269_v8  ;;  %v277_v24 = vld [vmem:[%s1475_s29 + $0xd0] sm:$0xff]  ;;  %v262_v25 = vld [vmem:[%s1475_s29 + $0x58] sm:$0xff]  ;;  %v263_v26 = vld [vmem:[%s1475_s29 + $0x60] sm:$0xff] }
  0x1d   : > { %v278_v27 = vld [vmem:[%s1475_s29 + $0xd8] sm:$0xff]  ;;  %v279_v28 = vld [vmem:[%s1475_s29 + $0xe0] sm:$0xff]  ;;  %v264_v29 = vld [vmem:[%s1475_s29 + $0x68] sm:$0xff] }
  0x1e   : > { %1213 = vmatmul.mubr.msk.f32.gmra.mrb[2].mxu0 %vm285_vm0, %v254_v9  ;;  %v265_v30 = vld [vmem:[%s1475_s29 + $0x70] sm:$0xff]  ;;  %v280_v31 = vld [vmem:[%s1475_s29 + $0xe8] sm:$0xff]  ;;  %v266_v33 = vld [vmem:[%s1475_s29 + $0x78] sm:$0xff] }
  0x1f   : > { %1215 = vmatprep.mubr.msk.f32.mxu0 %vm285_vm0, %v255_v10  ;;  %1237 = vmatmul.mubr.msk.f32.gmra.mrb[2].mxu1 %vm285_vm0, %v270_v11  ;;  %v281_v32 = vld [vmem:[%s1475_s29 + $0xf0] sm:$0xff]  ;;  %v282_v34 = vld [vmem:[%s1475_s29 + $0xf8] sm:$0xff] }
  0x20   : > { %1239 = vmatprep.mubr.msk.f32.mxu1 %vm285_vm0, %v271_v12 }
  0x22   : > { %1216 = vmatmul.mubr.msk.f32.gmra.mrb[4].mxu0 %vm285_vm0, %v256_v13 }
  0x23   : > { %1218 = vmatprep.mubr.msk.f32.mxu0 %vm285_vm0, %v257_v14  ;;  %1240 = vmatmul.mubr.msk.f32.gmra.mrb[4].mxu1 %vm285_vm0, %v272_v15 }
  0x24   : > { %1242 = vmatprep.mubr.msk.f32.mxu1 %vm285_vm0, %v273_v16 }
  0x26   : > { %1219 = vmatmul.mubr.msk.f32.gmra.mrb[6].mxu0 %vm285_vm0, %v258_v17 }
  0x27   : > { %1221 = vmatprep.mubr.msk.f32.mxu0 %vm285_vm0, %v259_v18  ;;  %1243 = vmatmul.mubr.msk.f32.gmra.mrb[6].mxu1 %vm285_vm0, %v274_v19 }
  0x28   : > { %1245 = vmatprep.mubr.msk.f32.mxu1 %vm285_vm0, %v275_v20 }
  0x2a   : > { %1222 = vmatmul.mubr.msk.f32.gmra.mrb[8].mxu0 %vm285_vm0, %v260_v21 }
  0x2b   : > { %1224 = vmatprep.mubr.msk.f32.mxu0 %vm285_vm0, %v261_v22  ;;  %1246 = vmatmul.mubr.msk.f32.gmra.mrb[8].mxu1 %vm285_vm0, %v276_v23 }
  0x2c   : > { %1248 = vmatprep.mubr.msk.f32.mxu1 %vm285_vm0, %v277_v24 }
  0x2e   : > { %1225 = vmatmul.mubr.msk.f32.gmra.mrb[10].mxu0 %vm285_vm0, %v262_v25 }
  0x2f   : > { %1227 = vmatprep.mubr.msk.f32.mxu0 %vm285_vm0, %v263_v26  ;;  %1249 = vmatmul.mubr.msk.f32.gmra.mrb[10].mxu1 %vm285_vm0, %v278_v27 }
  0x30   : > { %1251 = vmatprep.mubr.msk.f32.mxu1 %vm285_vm0, %v279_v28 }
  0x32   : > { %1228 = vmatmul.mubr.msk.f32.gmra.mrb[12].mxu0 %vm285_vm0, %v264_v29 }
  0x33   : > { %1230 = vmatprep.mubr.msk.f32.mxu0 %vm285_vm0, %v265_v30  ;;  %1252 = vmatmul.mubr.msk.f32.gmra.mrb[12].mxu1 %vm285_vm0, %v280_v31 }
  0x34   : > { %1254 = vmatprep.mubr.msk.f32.mxu1 %vm285_vm0, %v281_v32 }
  0x36   : > { %1231 = vmatmul.mubr.msk.f32.gmra.mrb[14].mxu0 %vm285_vm0, %v266_v33 }
  0x37   : > { %1255 = vmatmul.mubr.msk.f32.gmra.mrb[14].mxu1 %vm285_vm0, %v282_v34 }
  0xed   : > { %v1541_v35 = vpop.f32.mrb[0].mxu0 }
  0xee   : > { %v640_v36 = vmin.f32 %v1541_v35, 0.0  ;;  %v1544_v37 = vpop.f32.mrb[1].mxu0  ;;  %v1546_v38 = vpop.f32.mrb[0].mxu1  ;;  %vm608_vm1 = vcmp.gt.f32.partialorder %v1541_v35, 0.0 }
  0xef   : > { %v639_v39 = vmin.f32 %v1544_v37, 0.0  ;;  %v656_v40 = vmin.f32 %v1546_v38, 0.0  ;;  %v1550_v41 = vpop.f32.mrb[1].mxu1  ;;  %vm607_vm2 = vcmp.gt.f32.partialorder %v1544_v37, 0.0  ;;  %vm624_vm3 = vcmp.gt.f32.partialorder %v1546_v38, 0.0 }
  0xf0   : > { %v673_v42 = vmul.f32 1.442695, %v640_v36  ;;  %v655_v43 = vmin.f32 %v1550_v41, 0.0  ;;  %vm623_vm5 = vcmp.gt.f32.partialorder %v1550_v41, 0.0 }
  0xf1   : > { %v671_v44 = vmul.f32 1.442695, %v639_v39  ;;  %v1553_v45 = vpop.f32.mrb[2].mxu0  ;;  %v705_v46 = vmul.f32 1.442695, %v656_v40 }
  0xf2   : > { %1303 = vpow2.f32 %v673_v42  ;;  %v642_v47 = vmin.f32 %v1553_v45, 0.0  ;;  %v1556_v48 = vpop.f32.mrb[3].mxu0  ;;  %v703_v49 = vmul.f32 1.442695, %v655_v43  ;;  %v1558_v50 = vpop.f32.mrb[2].mxu1  ;;  %vm610_vm4 = vcmp.gt.f32.partialorder %v1553_v45, 0.0 }
  0xf3   : > { %1305 = vpow2.f32 %v671_v44  ;;  %v641_v51 = vmin.f32 %v1556_v48, 0.0  ;;  %v1561_v52 = vpop.f32.mrb[3].mxu1  ;;  %v658_v54 = vmin.f32 %v1558_v50, 0.0  ;;  %vm609_vm6 = vcmp.gt.f32.partialorder %v1556_v48, 0.0 }
  0xf4   : > { %v677_v53 = vmul.f32 1.442695, %v642_v47  ;;  %1307 = vpow2.f32 %v705_v46  ;;  %v657_v57 = vmin.f32 %v1561_v52, 0.0  ;;  %vm626_vm7 = vcmp.gt.f32.partialorder %v1558_v50, 0.0 }
  0xf5   : > { %v675_v55 = vmul.f32 1.442695, %v641_v51  ;;  %v1564_v56 = vpop.f32.mrb[4].mxu0  ;;  %1309 = vpow2.f32 %v703_v49  ;;  %v709_v60 = vmul.f32 1.442695, %v658_v54  ;;  %vm625_vm8 = vcmp.gt.f32.partialorder %v1561_v52, 0.0 }
  0xf6   : > { %1311 = vpow2.f32 %v677_v53  ;;  %v644_v58 = vmin.f32 %v1564_v56, 0.0  ;;  %v1568_v59 = vpop.f32.mrb[5].mxu0  ;;  %v1570_v61 = vpop.f32.mrb[4].mxu1  ;;  %v707_v63 = vmul.f32 1.442695, %v657_v57  ;;  %vm612_vm9 = vcmp.gt.f32.partialorder %v1564_v56, 0.0 }
  0xf7   : > { %1313 = vpow2.f32 %v675_v55  ;;  %v643_v62 = vmin.f32 %v1568_v59, 0.0  ;;  %v1573_v0 = vpop.f32.mrb[5].mxu1  ;;  %v660_v2 = vmin.f32 %v1570_v61, 0.0  ;;  %vm611_vm10 = vcmp.gt.f32.partialorder %v1568_v59, 0.0 }
  0xf8   : > { %v681_v1 = vmul.f32 1.442695, %v644_v58  ;;  %1315 = vpow2.f32 %v709_v60  ;;  %v659_v5 = vmin.f32 %v1573_v0, 0.0  ;;  %vm628_vm11 = vcmp.gt.f32.partialorder %v1570_v61, 0.0 }
  0xf9   : > { %v679_v3 = vmul.f32 1.442695, %v643_v62  ;;  %v1577_v4 = vpop.f32.mrb[6].mxu0  ;;  %1317 = vpow2.f32 %v707_v63  ;;  %v713_v8 = vmul.f32 1.442695, %v660_v2  ;;  %vm627_vm12 = vcmp.gt.f32.partialorder %v1573_v0, 0.0 }
  0xfa   : > { %1319 = vpow2.f32 %v681_v1  ;;  %v646_v6 = vmin.f32 %v1577_v4, 0.0  ;;  %v1582_v7 = vpop.f32.mrb[7].mxu0  ;;  %v1584_v9 = vpop.f32.mrb[6].mxu1  ;;  %v711_v11 = vmul.f32 1.442695, %v659_v5  ;;  %vm614_vm13 = vcmp.gt.f32.partialorder %v1577_v4, 0.0 }
  0xfb   : > { %1321 = vpow2.f32 %v679_v3  ;;  %v645_v10 = vmin.f32 %v1582_v7, 0.0  ;;  %v1588_v12 = vpop.f32.mrb[7].mxu1  ;;  %vm613_vm14 = vcmp.gt.f32.partialorder %v1582_v7, 0.0 }
  0xfc   : > { %v1304_v13 = vpop.eup %1303  ;;  %v685_v14 = vmul.f32 1.442695, %v646_v6  ;;  %1323 = vpow2.f32 %v713_v8 }
  0xfd   : > { %v1306_v15 = vpop.eup %1305  ;;  %v1137_v16 = vadd.f32 -1.0, %v1304_v13  ;;  %v683_v17 = vmul.f32 1.442695, %v645_v10  ;;  %v1600_v18 = vpop.f32.mrb[8].mxu0  ;;  %1325 = vpow2.f32 %v711_v11 }
  0xfe   : > { %v1308_v19 = vpop.eup %1307  ;;  %v1136_v20 = vadd.f32 -1.0, %v1306_v15  ;;  %1327 = vpow2.f32 %v685_v14  ;;  %v648_v21 = vmin.f32 %v1600_v18, 0.0  ;;  %v1603_v22 = vpop.f32.mrb[9].mxu0  ;;  %vm616_vm15 = vcmp.gt.f32.partialorder %v1600_v18, 0.0 }
  0xff   : > { %v1606_v23 = vpop.f32.mrb[8].mxu1  ;;  %v1310_v24 = vpop.eup %1309  ;;  %v768_v25 = vsel %vm608_vm1, %v1541_v35, %v1137_v16  ;;  %1329 = vpow2.f32 %v683_v17  ;;  %v1153_v26 = vadd.f32 -1.0, %v1308_v19  ;;  %v647_v51 = vmin.f32 %v1603_v22, 0.0 }
 0x100   : > { %v1612_v27 = vpop.f32.mrb[9].mxu1  ;;  %v1312_v28 = vpop.eup %1311  ;;  %800 = vst [vmem:[%s1597_s5 + $0x8] sm:$0xff] %v768_v25  ;;  %v869_v29 = vmul.f32 %v768_v25, %v768_v25  ;;  %v767_v30 = vsel %vm607_vm2, %v1544_v37, %v1136_v20  ;;  %v1152_v31 = vadd.f32 -1.0, %v1310_v24  ;;  %v689_v32 = vmul.f32 1.442695, %v648_v21 }
 0x101   : > { %v1314_v33 = vpop.eup %1313  ;;  %799 = vst [vmem:[%s1597_s5] sm:$0xff] %v767_v30  ;;  %v831_v34 = vadd.f32 %v768_v25, %v767_v30  ;;  %v868_v35 = vmul.f32 %v767_v30, %v767_v30  ;;  %v1139_v36 = vadd.f32 -1.0, %v1312_v28  ;;  %v1622_v39 = vsel %vm624_vm3, %v1546_v38, %v1153_v26  ;;  %v1624_v40 = vpop.f32.mrb[10].mxu0 }
 0x102   : > { %v1316_v42 = vpop.eup %1315  ;;  %v1138_v43 = vadd.f32 -1.0, %v1314_v33  ;;  %816 = vst [vmem:[%s1597_s5 + $0x88] sm:$0xff] %v1622_v39  ;;  %v1632_v37 = vsel %vm623_vm5, %v1550_v41, %v1152_v31  ;;  %1331 = vpow2.f32 %v689_v32  ;;  %v1634_v44 = vpop.f32.mrb[11].mxu0  ;;  %v687_v63 = vmul.f32 1.442695, %v647_v51 }
 0x103   : > { %v1636_v38 = vpop.f32.mrb[10].mxu1  ;;  %v1318_v46 = vpop.eup %1317  ;;  %v900_v47 = vadd.f32 %v869_v29, %v868_v35  ;;  %v770_v49 = vsel %vm610_vm4, %v1553_v45, %v1139_v36  ;;  %815 = vst [vmem:[%s1597_s5 + $0x80] sm:$0xff] %v1632_v37  ;;  %v1155_v55 = vadd.f32 -1.0, %v1316_v42  ;;  %v649_v29 = vmin.f32 %v1634_v44, 0.0 }
 0x104   : > { %v1645_v41 = vpop.f32.mrb[11].mxu1  ;;  %v1320_v53 = vpop.eup %1319  ;;  %802 = vst [vmem:[%s1597_s5 + $0x18] sm:$0xff] %v770_v49  ;;  %v769_v54 = vsel %vm609_vm6, %v1556_v48, %v1138_v43  ;;  %v1154_v57 = vadd.f32 -1.0, %v1318_v46  ;;  %v871_v3 = vmul.f32 %v770_v49, %v770_v49  ;;  %1333 = vpow2.f32 %v687_v63 }
 0x105   : > { %v1322_v58 = vpop.eup %1321  ;;  %801 = vst [vmem:[%s1597_s5 + $0x10] sm:$0xff] %v769_v54  ;;  %v832_v45 = vadd.f32 %v831_v34, %v769_v54  ;;  %v870_v60 = vmul.f32 %v769_v54, %v769_v54  ;;  %v1141_v62 = vadd.f32 -1.0, %v1320_v53  ;;  %v1654_v1 = vpop.f32.mrb[12].mxu0  ;;  %v1659_v5 = vsel %vm626_vm7, %v1558_v50, %v1155_v55 }
 0x106   : > { %v1324_v2 = vpop.eup %1323  ;;  %v1140_v48 = vadd.f32 -1.0, %v1322_v58  ;;  %v1664_v6 = vsel %vm625_vm8, %v1561_v52, %v1154_v57  ;;  %v1666_v8 = vpop.f32.mrb[13].mxu0  ;;  %818 = vst [vmem:[%s1597_s5 + $0x98] sm:$0xff] %v1659_v5  ;;  %vm615_vm0 = vcmp.gt.f32.partialorder %v1603_v22, 0.0  ;;  %vm618_vm1 = vcmp.gt.f32.partialorder %v1624_v40, 0.0 }
 0x107   : > { %v1668_v10 = vpop.f32.mrb[12].mxu1  ;;  %v1326_v11 = vpop.eup %1325  ;;  %v901_v13 = vadd.f32 %v900_v47, %v870_v60  ;;  %v772_v14 = vsel %vm612_vm9, %v1564_v56, %v1141_v62  ;;  %v833_v15 = vadd.f32 %v832_v45, %v770_v49  ;;  %817 = vst [vmem:[%s1597_s5 + $0x90] sm:$0xff] %v1664_v6  ;;  %v662_v56 = vmin.f32 %v1584_v9, 0.0 }
 0x108   : > { %v1677_v50 = vpop.f32.mrb[13].mxu1  ;;  %v1328_v52 = vpop.eup %1327  ;;  %804 = vst [vmem:[%s1597_s5 + $0x28] sm:$0xff] %v772_v14  ;;  %v771_v16 = vsel %vm611_vm10, %v1568_v59, %v1140_v48  ;;  %v873_v26 = vmul.f32 %v772_v14, %v772_v14  ;;  %v650_v59 = vmin.f32 %v1624_v40, 0.0  ;;  %v1157_v35 = vadd.f32 -1.0, %v1324_v2 }
 0x109   : > { %v1330_v17 = vpop.eup %1329  ;;  %803 = vst [vmem:[%s1597_s5 + $0x20] sm:$0xff] %v771_v16  ;;  %v834_v19 = vadd.f32 %v833_v15, %v771_v16  ;;  %v872_v20 = vmul.f32 %v771_v16, %v771_v16  ;;  %v902_v21 = vadd.f32 %v901_v13, %v871_v3  ;;  %v1143_v24 = vadd.f32 -1.0, %v1328_v52  ;;  %v1687_v25 = vpop.f32.mrb[14].mxu0 }
 0x10a   : > { %v1142_v28 = vadd.f32 -1.0, %v1330_v17  ;;  %v1691_v30 = vpop.f32.mrb[15].mxu0  ;;  %v1693_v31 = vpop.f32.mrb[14].mxu1  ;;  %v693_v46 = vmul.f32 1.442695, %v650_v59  ;;  %v1709_v55 = vsel %vm628_vm11, %v1570_v61, %v1157_v35  ;;  %v652_v62 = vmin.f32 %v1654_v1, 0.0 }
 0x10b   : > { %v903_v32 = vadd.f32 %v902_v21, %v872_v20  ;;  %v774_v33 = vsel %vm614_vm13, %v1577_v4, %v1143_v24  ;;  %v835_v34 = vadd.f32 %v834_v19, %v772_v14  ;;  %v1698_v36 = vpop.f32.mrb[15].mxu1  ;;  %v691_v47 = vmul.f32 1.442695, %v649_v29  ;;  %820 = vst [vmem:[%s1597_s5 + $0xa8] sm:$0xff] %v1709_v55 }
 0x10c   : > { %v1332_v42 = vpop.eup %1331  ;;  %806 = vst [vmem:[%s1597_s5 + $0x38] sm:$0xff] %v774_v33  ;;  %v773_v43 = vsel %vm613_vm14, %v1582_v7, %v1142_v28  ;;  %v875_v54 = vmul.f32 %v774_v33, %v774_v33  ;;  %1335 = vpow2.f32 %v693_v46  ;;  %v1156_v7 = vadd.f32 -1.0, %v1326_v11 }
 0x10d   : > { %805 = vst [vmem:[%s1597_s5 + $0x30] sm:$0xff] %v773_v43  ;;  %v836_v49 = vadd.f32 %v835_v34, %v773_v43  ;;  %v874_v51 = vmul.f32 %v773_v43, %v773_v43  ;;  %v904_v4 = vadd.f32 %v903_v32, %v873_v26  ;;  %v1145_v53 = vadd.f32 -1.0, %v1332_v42 }
 0x10e   : > { %1337 = vpow2.f32 %v691_v47  ;;  %v1718_v60 = vsel %vm627_vm12, %v1573_v0, %v1156_v7  ;;  %v1334_v63 = vpop.eup %1333  ;;  %v651_v2 = vmin.f32 %v1666_v8, 0.0  ;;  %v697_v3 = vmul.f32 1.442695, %v652_v62 }
 0x10f   : > { %v905_v57 = vadd.f32 %v904_v4, %v874_v51  ;;  %v776_v58 = vsel %vm616_vm15, %v1600_v18, %v1145_v53  ;;  %v837_v45 = vadd.f32 %v836_v49, %v774_v33  ;;  %819 = vst [vmem:[%s1597_s5 + $0xa0] sm:$0xff] %v1718_v60  ;;  %v1144_v18 = vadd.f32 -1.0, %v1334_v63 }
 0x110   : > { %808 = vst [vmem:[%s1597_s5 + $0x48] sm:$0xff] %v776_v58  ;;  %v717_v48 = vmul.f32 1.442695, %v662_v56  ;;  %v661_v11 = vmin.f32 %v1588_v12, 0.0  ;;  %v695_v13 = vmul.f32 1.442695, %v651_v2  ;;  %1339 = vpow2.f32 %v697_v3 }
 0x111   : > { %v906_v61 = vadd.f32 %v905_v57, %v875_v54  ;;  %v654_v0 = vmin.f32 %v1687_v25, 0.0  ;;  %v775_v14 = vsel %vm615_vm0, %v1603_v22, %v1144_v18  ;;  %v653_v52 = vmin.f32 %v1691_v30, 0.0 }
 0x112   : > { %v715_v15 = vmul.f32 1.442695, %v661_v11  ;;  %807 = vst [vmem:[%s1597_s5 + $0x40] sm:$0xff] %v775_v14  ;;  %v838_v16 = vadd.f32 %v837_v45, %v775_v14  ;;  %v876_v17 = vmul.f32 %v775_v14, %v775_v14  ;;  %1341 = vpow2.f32 %v695_v13 }
 0x113   : > { %v701_v19 = vmul.f32 1.442695, %v654_v0  ;;  %1343 = vpow2.f32 %v717_v48  ;;  %v699_v56 = vmul.f32 1.442695, %v653_v52  ;;  %v664_v20 = vmin.f32 %v1606_v23, 0.0 }
 0x114   : > { %v877_v21 = vmul.f32 %v776_v58, %v776_v58  ;;  %v907_v24 = vadd.f32 %v906_v61, %v876_v17  ;;  %v839_v26 = vadd.f32 %v838_v16, %v776_v58  ;;  %1345 = vpow2.f32 %v715_v15 }
 0x115   : > { %vm630_vm2 = vcmp.gt.f32.partialorder %v1584_v9, 0.0  ;;  %1347 = vpow2.f32 %v701_v19  ;;  %v721_v22 = vmul.f32 1.442695, %v664_v20  ;;  %v663_v59 = vmin.f32 %v1612_v27, 0.0 }
 0x116   : > { %v1336_v28 = vpop.eup %1335  ;;  %v908_v33 = vadd.f32 %v907_v24, %v877_v21  ;;  %vm629_vm3 = vcmp.gt.f32.partialorder %v1588_v12, 0.0  ;;  %1349 = vpow2.f32 %v699_v56  ;;  %v666_v34 = vmin.f32 %v1636_v38, 0.0 }
 0x117   : > { %v1147_v32 = vadd.f32 -1.0, %v1336_v28  ;;  %vm617_vm4 = vcmp.gt.f32.partialorder %v1634_v44, 0.0  ;;  %1351 = vpow2.f32 %v721_v22  ;;  %v719_v42 = vmul.f32 1.442695, %v663_v59 }
 0x118   : > { %v1338_v29 = vpop.eup %1337  ;;  %vm620_vm5 = vcmp.gt.f32.partialorder %v1654_v1, 0.0  ;;  %v725_v46 = vmul.f32 1.442695, %v666_v34  ;;  %v665_v47 = vmin.f32 %v1645_v41, 0.0  ;;  %vm619_vm6 = vcmp.gt.f32.partialorder %v1666_v8, 0.0 }
 0x119   : > { %v1146_v35 = vadd.f32 -1.0, %v1338_v29  ;;  %v778_v43 = vsel %vm618_vm1, %v1624_v40, %v1147_v32  ;;  %1353 = vpow2.f32 %v719_v42  ;;  %v668_v51 = vmin.f32 %v1668_v10, 0.0 }
 0x11a   : > { %810 = vst [vmem:[%s1597_s5 + $0x58] sm:$0xff] %v778_v43  ;;  %1355 = vpow2.f32 %v725_v46  ;;  %v723_v54 = vmul.f32 1.442695, %v665_v47  ;;  %v1340_v7 = vpop.eup %1339  ;;  %v879_v40 = vmul.f32 %v778_v43, %v778_v43  ;;  %vm622_vm7 = vcmp.gt.f32.partialorder %v1687_v25, 0.0 }
 0x11b   : > { %v777_v49 = vsel %vm617_vm4, %v1634_v44, %v1146_v35  ;;  %v729_v57 = vmul.f32 1.442695, %v668_v51  ;;  %v667_v58 = vmin.f32 %v1677_v50, 0.0  ;;  %v1149_v62 = vadd.f32 -1.0, %v1340_v7 }
 0x11c   : > { %809 = vst [vmem:[%s1597_s5 + $0x50] sm:$0xff] %v777_v49  ;;  %v840_v4 = vadd.f32 %v839_v26, %v777_v49  ;;  %v878_v53 = vmul.f32 %v777_v49, %v777_v49  ;;  %v1342_v45 = vpop.eup %1341  ;;  %1357 = vpow2.f32 %v723_v54  ;;  %v670_v3 = vmin.f32 %v1693_v31, 0.0 }
 0x11d   : > { %v1344_v61 = vpop.eup %1343  ;;  %v1148_v2 = vadd.f32 -1.0, %v1342_v45  ;;  %1359 = vpow2.f32 %v729_v57  ;;  %v727_v18 = vmul.f32 1.442695, %v667_v58  ;;  %v780_v11 = vsel %vm620_vm5, %v1654_v1, %v1149_v62 }
 0x11e   : > { %v909_v44 = vadd.f32 %v908_v33, %v878_v53  ;;  %v841_v63 = vadd.f32 %v840_v4, %v778_v43  ;;  %v1346_v48 = vpop.eup %1345  ;;  %v1159_v0 = vadd.f32 -1.0, %v1344_v61  ;;  %vm621_vm8 = vcmp.gt.f32.partialorder %v1691_v30, 0.0  ;;  %812 = vst [vmem:[%s1597_s5 + $0x68] sm:$0xff] %v780_v11 }
 0x11f   : > { %v1348_v14 = vpop.eup %1347  ;;  %v779_v15 = vsel %vm619_vm6, %v1666_v8, %v1148_v2  ;;  %v1158_v52 = vadd.f32 -1.0, %v1346_v48  ;;  %vm632_vm9 = vcmp.gt.f32.partialorder %v1606_v23, 0.0  ;;  %1361 = vpow2.f32 %v727_v18 }
 0x120   : > { %v910_v13 = vadd.f32 %v909_v44, %v879_v40  ;;  %v1350_v16 = vpop.eup %1349  ;;  %811 = vst [vmem:[%s1597_s5 + $0x60] sm:$0xff] %v779_v15  ;;  %v842_v17 = vadd.f32 %v841_v63, %v779_v15  ;;  %v880_v1 = vmul.f32 %v779_v15, %v779_v15  ;;  %v1761_v19 = vsel %vm630_vm2, %v1584_v9, %v1159_v0 }
 0x121   : > { %v1151_v56 = vadd.f32 -1.0, %v1348_v14  ;;  %v1352_v20 = vpop.eup %1351  ;;  %822 = vst [vmem:[%s1597_s5 + $0xb8] sm:$0xff] %v1761_v19  ;;  %v1768_v8 = vsel %vm629_vm3, %v1588_v12, %v1158_v52  ;;  %v1150_v21 = vadd.f32 -1.0, %v1350_v16  ;;  %vm631_vm10 = vcmp.gt.f32.partialorder %v1612_v27, 0.0 }
 0x122   : > { %v733_v24 = vmul.f32 1.442695, %v670_v3  ;;  %v881_v26 = vmul.f32 %v780_v11, %v780_v11  ;;  %v911_v28 = vadd.f32 %v910_v13, %v880_v1  ;;  %821 = vst [vmem:[%s1597_s5 + $0xb0] sm:$0xff] %v1768_v8  ;;  %v843_v22 = vadd.f32 %v842_v17, %v780_v11 }
 0x123   : > { %v782_v9 = vsel %vm622_vm7, %v1687_v25, %v1151_v56  ;;  %v1354_v59 = vpop.eup %1353  ;;  %v781_v12 = vsel %vm621_vm8, %v1691_v30, %v1150_v21  ;;  %v1161_v29 = vadd.f32 -1.0, %v1352_v20  ;;  %vm634_vm11 = vcmp.gt.f32.partialorder %v1636_v38, 0.0 }
 0x124   : > { %814 = vst [vmem:[%s1597_s5 + $0x78] sm:$0xff] %v782_v9  ;;  %1363 = vpow2.f32 %v733_v24  ;;  %v1356_v32 = vpop.eup %1355  ;;  %813 = vst [vmem:[%s1597_s5 + $0x70] sm:$0xff] %v781_v12  ;;  %v844_v33 = vadd.f32 %v843_v22, %v781_v12  ;;  %v882_v34 = vmul.f32 %v781_v12, %v781_v12  ;;  %v912_v35 = vadd.f32 %v911_v28, %v881_v26 }
 0x125   : > { %v1160_v42 = vadd.f32 -1.0, %v1354_v59  ;;  %v1785_v25 = vsel %vm632_vm9, %v1606_v23, %v1161_v29  ;;  %v1163_v43 = vadd.f32 -1.0, %v1356_v32  ;;  %vm633_vm12 = vcmp.gt.f32.partialorder %v1645_v41, 0.0 }
 0x126   : > { %v669_v30 = vmin.f32 %v1698_v36, 0.0  ;;  %v1358_v46 = vpop.eup %1357  ;;  %v883_v47 = vmul.f32 %v782_v9, %v782_v9  ;;  %v845_v49 = vadd.f32 %v844_v33, %v782_v9  ;;  %v913_v51 = vadd.f32 %v912_v35, %v882_v34  ;;  %824 = vst [vmem:[%s1597_s5 + $0xc8] sm:$0xff] %v1785_v25 }
 0x127   : > { %v791_v4 = vsel %vm631_vm10, %v1612_v27, %v1160_v42  ;;  %v1360_v53 = vpop.eup %1359  ;;  %v794_v23 = vsel %vm634_vm11, %v1636_v38, %v1163_v43  ;;  %v1162_v54 = vadd.f32 -1.0, %v1358_v46  ;;  %vm636_vm13 = vcmp.gt.f32.partialorder %v1668_v10, 0.0 }
 0x128   : > { %823 = vst [vmem:[%s1597_s5 + $0xc0] sm:$0xff] %v791_v4  ;;  %v731_v7 = vmul.f32 1.442695, %v669_v30  ;;  %v884_v40 = vmul.f32 %v1632_v37, %v1632_v37  ;;  %v846_v57 = vadd.f32 %v845_v49, %v1632_v37  ;;  %v914_v58 = vadd.f32 %v913_v51, %v883_v47  ;;  %826 = vst [vmem:[%s1597_s5 + $0xd8] sm:$0xff] %v794_v23 }
 0x129   : > { %v1165_v27 = vadd.f32 -1.0, %v1360_v53  ;;  %v1362_v45 = vpop.eup %1361  ;;  %v885_v44 = vmul.f32 %v1622_v39, %v1622_v39  ;;  %v793_v38 = vsel %vm633_vm12, %v1645_v41, %v1162_v54  ;;  %vm635_vm14 = vcmp.gt.f32.partialorder %v1677_v50, 0.0 }
 0x12a   : > { %1365 = vpow2.f32 %v731_v7  ;;  %v847_v62 = vadd.f32 %v846_v57, %v1622_v39  ;;  %v915_v63 = vadd.f32 %v914_v58, %v884_v40  ;;  %825 = vst [vmem:[%s1597_s5 + $0xd0] sm:$0xff] %v793_v38  ;;  %v1164_v37 = vadd.f32 -1.0, %v1362_v45 }
 0x12b   : > { %v796_v61 = vsel %vm636_vm13, %v1668_v10, %v1165_v27  ;;  %v886_v2 = vmul.f32 %v1664_v6, %v1664_v6  ;;  %vm638_vm15 = vcmp.gt.f32.partialorder %v1693_v31, 0.0  ;;  %v887_v39 = vmul.f32 %v1659_v5, %v1659_v5 }
 0x12c   : > { %828 = vst [vmem:[%s1597_s5 + $0xe8] sm:$0xff] %v796_v61  ;;  %v848_v18 = vadd.f32 %v847_v62, %v1664_v6  ;;  %v916_v3 = vadd.f32 %v915_v63, %v885_v44  ;;  %v795_v48 = vsel %vm635_vm14, %v1677_v50, %v1164_v37  ;;  %v888_v0 = vmul.f32 %v1718_v60, %v1718_v60 }
 0x12d   : > { %827 = vst [vmem:[%s1597_s5 + $0xe0] sm:$0xff] %v795_v48  ;;  %v889_v50 = vmul.f32 %v1709_v55, %v1709_v55  ;;  %vm637_vm0 = vcmp.gt.f32.partialorder %v1698_v36, 0.0  ;;  %v890_v17 = vmul.f32 %v1768_v8, %v1768_v8  ;;  %v892_v26 = vmul.f32 %v791_v4, %v791_v4 }
 0x12e   : > { %v1364_v41 = vpop.eup %1363  ;;  %v849_v10 = vadd.f32 %v848_v18, %v1659_v5  ;;  %v917_v11 = vadd.f32 %v916_v3, %v886_v2  ;;  %v893_v9 = vmul.f32 %v1785_v25, %v1785_v25  ;;  %v894_v12 = vmul.f32 %v793_v38, %v793_v38 }
 0x12f   : > { %v1167_v13 = vadd.f32 -1.0, %v1364_v41  ;;  %v895_v32 = vmul.f32 %v794_v23, %v794_v23  ;;  %v897_v42 = vmul.f32 %v796_v61, %v796_v61  ;;  %vm937_vm1 = vcmask 1040384  }
 0x130   : > { %v918_v14 = vadd.f32 %v917_v11, %v887_v39  ;;  %v850_v6 = vadd.f32 %v849_v10, %v1718_v60 }
 0x131   : > { %v798_v15 = vsel %vm638_vm15, %v1693_v31, %v1167_v13  ;;  %v891_v31 = vmul.f32 %v1761_v19, %v1761_v19 }
 0x132   : > { %830 = vst [vmem:[%s1597_s5 + $0xf8] sm:$0xff] %v798_v15  ;;  %v851_v52 = vadd.f32 %v850_v6, %v1709_v55  ;;  %v919_v16 = vadd.f32 %v918_v14, %v888_v0  ;;  %v899_v51 = vmul.f32 %v798_v15, %v798_v15 }
 0x134   : > { %v1366_v5 = vpop.eup %1365  ;;  %v852_v1 = vadd.f32 %v851_v52, %v1768_v8  ;;  %v920_v56 = vadd.f32 %v919_v16, %v889_v50 }
 0x135   : > { %v1166_v60 = vadd.f32 -1.0, %v1366_v5 }
 0x136   : > { %v853_v20 = vadd.f32 %v852_v1, %v1761_v19  ;;  %v921_v21 = vadd.f32 %v920_v56, %v890_v17 }
 0x137   : > { %v797_v24 = vsel %vm637_vm0, %v1698_v36, %v1166_v60  ;;  %v896_v36 = vmul.f32 %v795_v48, %v795_v48 }
 0x138   : > { %829 = vst [vmem:[%s1597_s5 + $0xf0] sm:$0xff] %v797_v24  ;;  %v854_v55 = vadd.f32 %v853_v20, %v791_v4  ;;  %v922_v28 = vadd.f32 %v921_v21, %v891_v31  ;;  %v898_v47 = vmul.f32 %v797_v24, %v797_v24 }
 0x13a   : > { %v923_v22 = vadd.f32 %v922_v28, %v892_v26  ;;  %v855_v8 = vadd.f32 %v854_v55, %v1785_v25 }
 0x13c   : > { %v856_v59 = vadd.f32 %v855_v8, %v793_v38  ;;  %v924_v29 = vadd.f32 %v923_v22, %v893_v9 }
 0x13e   : > { %v925_v33 = vadd.f32 %v924_v29, %v894_v12  ;;  %v857_v19 = vadd.f32 %v856_v59, %v794_v23 }
 0x140   : > { %v858_v34 = vadd.f32 %v857_v19, %v795_v48  ;;  %v926_v35 = vadd.f32 %v925_v33, %v895_v32 }
 0x142   : > { %v927_v43 = vadd.f32 %v926_v35, %v896_v36  ;;  %v859_v30 = vadd.f32 %v858_v34, %v796_v61 }
 0x144   : > { %v860_v46 = vadd.f32 %v859_v30, %v797_v24  ;;  %v928_v49 = vadd.f32 %v927_v43, %v897_v42 }
 0x146   : > { %v861_v25 = vadd.f32 %v860_v46, %v798_v15  ;;  %v929_v4 = vadd.f32 %v928_v49, %v898_v47 }
 0x148   : > { %v862_v53 = vrot.slane %v861_v25, 4  ;;  %v930_v54 = vadd.f32 %v929_v4, %v899_v51 }
 0x14a   : > { %v863_v7 = vadd.f32 %v862_v53, %v861_v25  ;;  %v931_v23 = vrot.slane %v930_v54, 4 }
 0x14c   : > { %v864_v40 = vrot.slane %v863_v7, 2  ;;  %v932_v57 = vadd.f32 %v931_v23, %v930_v54 }
 0x14e   : > { %v865_v58 = vadd.f32 %v864_v40, %v863_v7  ;;  %v933_v27 = vrot.slane %v932_v57, 2 }
 0x150   : > { %v866_v45 = vrot.slane %v865_v58, 1  ;;  %v934_v44 = vadd.f32 %v933_v27, %v932_v57 }
 0x152   : > { %v935_v38 = vrot.slane %v934_v44, 1  ;;  %v867_v62 = vadd.f32 %v866_v45, %v865_v58 }
 0x154   : > { %v936_v63 = vadd.f32 %v935_v38, %v934_v44 }
 0x156   : > { %v938_v61 = vsel %vm937_vm1, %v867_v62, %v936_v63 }
 0x157   : > { %939 = vst [vmem:[%s250_s11] sm:$0x3] %v938_v61 }
 0x158 PF: > { %s14_s16 = sadd.s32 1, %s1405_s16   ;;  %s1867_s12 = smov %s1397_s14 }
 0x159   : > { %p11_p8 = scmp.ge.s32.totalorder %s14_s16, 10   ;;  %s1868_s13 = smov %s1401_s15 }
 0x15a   : > { %s1869_s14 = smov %s1872_s17  ;;  %s1870_s15 = smov %s1876_s18 }
 0x15b   :  { %13 = sbr.rel (!%p11_p8) target bundleno = 3 (0x3), region = 73 }

// kernel: squeeze.27
= control target key start
LH: loop header
LB: loop body
LE: loop exit
PB: predicated region body
PF: predicated region fallthrough
CT: control target
= control target key end

     0   :  { %vm604_vm0 = vcmask 973824   ;;  %vm645_vm1 = vcmask 982016   ;;  %s1061_s10 = smov 122   ;;  %vm3_vm2 = vcmask 121856   ;;  %s1062_s13 = smov 9   ;;  %vm687_vm3 = vcmask 1039360   ;;  %s2285_s0 = inlined_call_operand.vmem [shape: f32[1,480,8], index: 0, kind: input, shape index: {}]   ;;  %s2286_s1 = inlined_call_operand.vmem [shape: f32[2,16,15,8], index: 1, kind: output, shape index: {}]  }
   0x1   :  { %v1105_v0 = vld [vmem:[%s2285_s0 + $0x18] sm:$0xff]   ;;  %v1110_v1 = vld [vmem:[%s2285_s0 + $0x10] sm:$0xff]   ;;  %v1118_v3 = vld [vmem:[%s2285_s0] sm:$0xff]   ;;  %s1063_s2 = smov 121   ;;  %s1064_s3 = smov 8   ;;  %vm608_vm4 = vcmask 72704  }
   0x2   :  { %21 = vrot.lane.b32.xlu0 %v1105_v0, %s1061_s10  ;;  %v605_v2 = vsel %vm604_vm0, %v1105_v0, %v1110_v1  ;;  %v1123_v4 = vld [vmem:[%s2285_s0 + $0x8] sm:$0xff]   ;;  %4 = vst.msk [vmem:[%s2286_s1] sm:$0x1] %vm3_vm2, %v1118_v3   ;;  %725 = vst.msk [vmem:[%s2286_s1 + $0x1f] sm:$0x2] %vm3_vm2, %v1118_v3   ;;  %s1065_s4 = smov 1  }
   0x3   :  { %606 = vrot.lane.b32.xlu1 %v605_v2, %s1062_s13  ;;  %726 = vst.msk [vmem:[%s2286_s1 + $0x3e] sm:$0x4] %vm3_vm2, %v1118_v3   ;;  %727 = vst.msk [vmem:[%s2286_s1 + $0x5d] sm:$0x8] %vm3_vm2, %v1118_v3   ;;  %v646_v5 = vsel %vm645_vm1, %v1123_v4, %v1118_v3  ;;  %v688_v6 = vsel %vm687_vm3, %v1110_v1, %v1123_v4  ;;  %s1066_s5 = smov 114   ;;  %s1067_s6 = smov 113  }
   0x4   :  { %728 = vst.msk [vmem:[%s2286_s1 + $0x7c] sm:$0x10] %vm3_vm2, %v1118_v3   ;;  %729 = vst.msk [vmem:[%s2286_s1 + $0x9b] sm:$0x20] %vm3_vm2, %v1118_v3   ;;  %s1068_s7 = smov 107   ;;  %s1069_s8 = smov 106  }
   0x5   :  { %730 = vst.msk [vmem:[%s2286_s1 + $0xba] sm:$0x40] %vm3_vm2, %v1118_v3   ;;  %731 = vst.msk [vmem:[%s2286_s1 + $0xd9] sm:$0x80] %vm3_vm2, %v1118_v3   ;;  %s1070_s9 = smov 99   ;;  %s1071_s10 = smov 98  }
   0x6   :  { %42 = vrot.lane.b32.xlu0 %v1123_v4, %s1063_s2  ;;  %s1072_s11 = smov 92   ;;  %s1073_s12 = smov 91   ;;  %vm625_vm5 = vcmask 121928   ;;  %vm649_vm6 = vcmask 64512   ;;  %vm666_vm7 = vcmask 121920   ;;  %vm691_vm8 = vcmask 7168  }
   0x7   :  { %647 = vrot.lane.b32.xlu1 %v646_v5, %s1064_s3  ;;  %s1074_s13 = smov 84   ;;  %s1075_s14 = smov 83   ;;  %vm708_vm9 = vcmask 121864  }
   0x8   :  { %s1076_s15 = smov 77   ;;  %s1077_s0 = smov 76  }
   0x9   :  { %s1078_s16 = smov 69   ;;  %s1079_s17 = smov 68  }
   0xa   :  { %689 = vrot.lane.b32.xlu0 %v688_v6, %s1065_s4  ;;  %s1080_s18 = smov 62   ;;  %s1081_s19 = smov 61  }
   0xb   :  { %63 = vrot.lane.b32.xlu1 %v1110_v1, %s1066_s5  ;;  %s1082_s20 = smov 54   ;;  %s1083_s21 = smov 53  }
   0xc   :  { %s1084_s22 = smov 47   ;;  %s1085_s23 = smov 46  }
   0xd   :  { %s1086_s24 = smov 39   ;;  %s1087_s25 = smov 38  }
   0xe   :  { %83 = vrot.lane.b32.xlu0 %v1118_v3, %s1067_s6  ;;  %s1088_s26 = smov 31   ;;  %s1089_s27 = smov 24  }
   0xf   :  { %104 = vrot.lane.b32.xlu1 %v1105_v0, %s1068_s7  ;;  %s1090_s28 = smov 23   ;;  %s1091_s29 = smov 16  }
  0x12   :  { %125 = vrot.lane.b32.xlu0 %v1123_v4, %s1069_s8 }
  0x13   :  { %146 = vrot.lane.b32.xlu1 %v1110_v1, %s1070_s9 }
  0x16   :  { %166 = vrot.lane.b32.xlu0 %v1118_v3, %s1071_s10 }
  0x17   :  { %187 = vrot.lane.b32.xlu1 %v1105_v0, %s1072_s11 }
  0x1a   :  { %208 = vrot.lane.b32.xlu0 %v1123_v4, %s1073_s12 }
  0x1b   :  { %229 = vrot.lane.b32.xlu1 %v1110_v1, %s1074_s13 }
  0x1e   :  { %249 = vrot.lane.b32.xlu0 %v1118_v3, %s1075_s14 }
  0x1f   :  { %270 = vrot.lane.b32.xlu1 %v1105_v0, %s1076_s15 }
  0x22   :  { %291 = vrot.lane.b32.xlu0 %v1123_v4, %s1077_s0 }
  0x23   :  { %312 = vrot.lane.b32.xlu1 %v1110_v1, %s1078_s16 }
  0x26   :  { %332 = vrot.lane.b32.xlu0 %v1118_v3, %s1079_s17 }
  0x27   :  { %353 = vrot.lane.b32.xlu1 %v1105_v0, %s1080_s18 }
  0x2a   :  { %374 = vrot.lane.b32.xlu0 %v1123_v4, %s1081_s19 }
  0x2b   :  { %395 = vrot.lane.b32.xlu1 %v1110_v1, %s1082_s20 }
  0x2e   :  { %415 = vrot.lane.b32.xlu0 %v1118_v3, %s1083_s21 }
  0x2f   :  { %436 = vrot.lane.b32.xlu1 %v1105_v0, %s1084_s22 }
  0x32   :  { %457 = vrot.lane.b32.xlu0 %v1123_v4, %s1085_s23 }
  0x33   :  { %478 = vrot.lane.b32.xlu1 %v1110_v1, %s1086_s24 }
  0x36   :  { %498 = vrot.lane.b32.xlu0 %v1118_v3, %s1087_s25 }
  0x37   :  { %519 = vrot.lane.b32.xlu1 %v1123_v4, %s1088_s26 }
  0x3a   :  { %540 = vrot.lane.b32.xlu0 %v1110_v1, %s1089_s27 }
  0x3b   :  { %560 = vrot.lane.b32.xlu1 %v1118_v3, %s1090_s28 }
  0x3e   :  { %581 = vrot.lane.b32.xlu0 %v1123_v4, %s1091_s29 }
  0x74   :  { %v22_v7 = vpop.permute.xlu0 %21  }
  0x75   :  { %733 = vst.msk [vmem:[%s2286_s1 + $0x1a] sm:$0x1] %vm3_vm2, %v22_v7   ;;  %734 = vst.msk [vmem:[%s2286_s1 + $0x39] sm:$0x2] %vm3_vm2, %v22_v7   ;;  %v607_v8 = vpop.permute.xlu1 %606  }
  0x76   :  { %735 = vst.msk [vmem:[%s2286_s1 + $0x58] sm:$0x4] %vm3_vm2, %v22_v7   ;;  %736 = vst.msk [vmem:[%s2286_s1 + $0x77] sm:$0x8] %vm3_vm2, %v22_v7  }
  0x77   :  { %737 = vst.msk [vmem:[%s2286_s1 + $0x96] sm:$0x10] %vm3_vm2, %v22_v7   ;;  %738 = vst.msk [vmem:[%s2286_s1 + $0xb5] sm:$0x20] %vm3_vm2, %v22_v7  }
  0x78   :  { %739 = vst.msk [vmem:[%s2286_s1 + $0xd4] sm:$0x40] %vm3_vm2, %v22_v7   ;;  %740 = vst.msk [vmem:[%s2286_s1 + $0xf3] sm:$0x80] %vm3_vm2, %v22_v7   ;;  %v43_v9 = vpop.permute.xlu0 %42  }
  0x79   :  { %979 = vst.msk [vmem:[%s2286_s1 + $0x19] sm:$0x1] %vm608_vm4, %v607_v8   ;;  %980 = vst.msk [vmem:[%s2286_s1 + $0x38] sm:$0x2] %vm608_vm4, %v607_v8   ;;  %v648_v10 = vpop.permute.xlu1 %647  }
  0x7a   :  { %981 = vst.msk [vmem:[%s2286_s1 + $0x57] sm:$0x4] %vm608_vm4, %v607_v8   ;;  %982 = vst.msk [vmem:[%s2286_s1 + $0x76] sm:$0x8] %vm608_vm4, %v607_v8  }
  0x7b   :  { %983 = vst.msk [vmem:[%s2286_s1 + $0x95] sm:$0x10] %vm608_vm4, %v607_v8   ;;  %984 = vst.msk [vmem:[%s2286_s1 + $0xb4] sm:$0x20] %vm608_vm4, %v607_v8  }
  0x7c   :  { %985 = vst.msk [vmem:[%s2286_s1 + $0xd3] sm:$0x40] %vm608_vm4, %v607_v8   ;;  %986 = vst.msk [vmem:[%s2286_s1 + $0xf2] sm:$0x80] %vm608_vm4, %v607_v8   ;;  %v690_v11 = vpop.permute.xlu0 %689  }
  0x7d   :  { %987 = vst.msk [vmem:[%s2286_s1 + $0x19] sm:$0x1] %vm625_vm5, %v607_v8   ;;  %988 = vst.msk [vmem:[%s2286_s1 + $0x38] sm:$0x2] %vm625_vm5, %v607_v8   ;;  %v64_v12 = vpop.permute.xlu1 %63  }
  0x7e   :  { %989 = vst.msk [vmem:[%s2286_s1 + $0x57] sm:$0x4] %vm625_vm5, %v607_v8   ;;  %990 = vst.msk [vmem:[%s2286_s1 + $0x76] sm:$0x8] %vm625_vm5, %v607_v8  }
  0x7f   :  { %991 = vst.msk [vmem:[%s2286_s1 + $0x95] sm:$0x10] %vm625_vm5, %v607_v8   ;;  %992 = vst.msk [vmem:[%s2286_s1 + $0xb4] sm:$0x20] %vm625_vm5, %v607_v8  }
  0x80   :  { %993 = vst.msk [vmem:[%s2286_s1 + $0xd3] sm:$0x40] %vm625_vm5, %v607_v8   ;;  %994 = vst.msk [vmem:[%s2286_s1 + $0xf2] sm:$0x80] %vm625_vm5, %v607_v8   ;;  %v84_v13 = vpop.permute.xlu0 %83  }
  0x81   :  { %742 = vst.msk [vmem:[%s2286_s1 + $0x9] sm:$0x1] %vm3_vm2, %v43_v9   ;;  %743 = vst.msk [vmem:[%s2286_s1 + $0x28] sm:$0x2] %vm3_vm2, %v43_v9   ;;  %v105_v14 = vpop.permute.xlu1 %104  }
  0x82   :  { %744 = vst.msk [vmem:[%s2286_s1 + $0x47] sm:$0x4] %vm3_vm2, %v43_v9   ;;  %745 = vst.msk [vmem:[%s2286_s1 + $0x66] sm:$0x8] %vm3_vm2, %v43_v9  }
  0x83   :  { %746 = vst.msk [vmem:[%s2286_s1 + $0x85] sm:$0x10] %vm3_vm2, %v43_v9   ;;  %747 = vst.msk [vmem:[%s2286_s1 + $0xa4] sm:$0x20] %vm3_vm2, %v43_v9  }
  0x84   :  { %748 = vst.msk [vmem:[%s2286_s1 + $0xc3] sm:$0x40] %vm3_vm2, %v43_v9   ;;  %749 = vst.msk [vmem:[%s2286_s1 + $0xe2] sm:$0x80] %vm3_vm2, %v43_v9   ;;  %v126_v15 = vpop.permute.xlu0 %125  }
  0x85   :  { %996 = vst.msk [vmem:[%s2286_s1 + $0x8] sm:$0x1] %vm649_vm6, %v648_v10   ;;  %997 = vst.msk [vmem:[%s2286_s1 + $0x27] sm:$0x2] %vm649_vm6, %v648_v10   ;;  %v147_v16 = vpop.permute.xlu1 %146  }
  0x86   :  { %998 = vst.msk [vmem:[%s2286_s1 + $0x46] sm:$0x4] %vm649_vm6, %v648_v10   ;;  %999 = vst.msk [vmem:[%s2286_s1 + $0x65] sm:$0x8] %vm649_vm6, %v648_v10  }
  0x87   :  { %1000 = vst.msk [vmem:[%s2286_s1 + $0x84] sm:$0x10] %vm649_vm6, %v648_v10   ;;  %1001 = vst.msk [vmem:[%s2286_s1 + $0xa3] sm:$0x20] %vm649_vm6, %v648_v10  }
  0x88   :  { %1002 = vst.msk [vmem:[%s2286_s1 + $0xc2] sm:$0x40] %vm649_vm6, %v648_v10   ;;  %1003 = vst.msk [vmem:[%s2286_s1 + $0xe1] sm:$0x80] %vm649_vm6, %v648_v10   ;;  %v167_v17 = vpop.permute.xlu0 %166  }
  0x89   :  { %1004 = vst.msk [vmem:[%s2286_s1 + $0x8] sm:$0x1] %vm666_vm7, %v648_v10   ;;  %1005 = vst.msk [vmem:[%s2286_s1 + $0x27] sm:$0x2] %vm666_vm7, %v648_v10   ;;  %v188_v18 = vpop.permute.xlu1 %187  }
  0x8a   :  { %1006 = vst.msk [vmem:[%s2286_s1 + $0x46] sm:$0x4] %vm666_vm7, %v648_v10   ;;  %1007 = vst.msk [vmem:[%s2286_s1 + $0x65] sm:$0x8] %vm666_vm7, %v648_v10  }
  0x8b   :  { %1008 = vst.msk [vmem:[%s2286_s1 + $0x84] sm:$0x10] %vm666_vm7, %v648_v10   ;;  %1009 = vst.msk [vmem:[%s2286_s1 + $0xa3] sm:$0x20] %vm666_vm7, %v648_v10  }
  0x8c   :  { %1010 = vst.msk [vmem:[%s2286_s1 + $0xc2] sm:$0x40] %vm666_vm7, %v648_v10   ;;  %1011 = vst.msk [vmem:[%s2286_s1 + $0xe1] sm:$0x80] %vm666_vm7, %v648_v10   ;;  %v209_v19 = vpop.permute.xlu0 %208  }
  0x8d   :  { %1014 = vst.msk [vmem:[%s2286_s1 + $0x11] sm:$0x1] %vm691_vm8, %v690_v11   ;;  %1015 = vst.msk [vmem:[%s2286_s1 + $0x30] sm:$0x2] %vm691_vm8, %v690_v11   ;;  %v230_v20 = vpop.permute.xlu1 %229  }
  0x8e   :  { %1016 = vst.msk [vmem:[%s2286_s1 + $0x4f] sm:$0x4] %vm691_vm8, %v690_v11   ;;  %1017 = vst.msk [vmem:[%s2286_s1 + $0x6e] sm:$0x8] %vm691_vm8, %v690_v11  }
  0x8f   :  { %1018 = vst.msk [vmem:[%s2286_s1 + $0x8d] sm:$0x10] %vm691_vm8, %v690_v11   ;;  %1019 = vst.msk [vmem:[%s2286_s1 + $0xac] sm:$0x20] %vm691_vm8, %v690_v11  }
  0x90   :  { %1020 = vst.msk [vmem:[%s2286_s1 + $0xcb] sm:$0x40] %vm691_vm8, %v690_v11   ;;  %1021 = vst.msk [vmem:[%s2286_s1 + $0xea] sm:$0x80] %vm691_vm8, %v690_v11   ;;  %v250_v21 = vpop.permute.xlu0 %249  }
  0x91   :  { %1022 = vst.msk [vmem:[%s2286_s1 + $0x11] sm:$0x1] %vm708_vm9, %v690_v11   ;;  %1023 = vst.msk [vmem:[%s2286_s1 + $0x30] sm:$0x2] %vm708_vm9, %v690_v11   ;;  %v271_v22 = vpop.permute.xlu1 %270  }
  0x92   :  { %1024 = vst.msk [vmem:[%s2286_s1 + $0x4f] sm:$0x4] %vm708_vm9, %v690_v11   ;;  %1025 = vst.msk [vmem:[%s2286_s1 + $0x6e] sm:$0x8] %vm708_vm9, %v690_v11  }
  0x93   :  { %1026 = vst.msk [vmem:[%s2286_s1 + $0x8d] sm:$0x10] %vm708_vm9, %v690_v11   ;;  %1027 = vst.msk [vmem:[%s2286_s1 + $0xac] sm:$0x20] %vm708_vm9, %v690_v11  }
  0x94   :  { %1028 = vst.msk [vmem:[%s2286_s1 + $0xcb] sm:$0x40] %vm708_vm9, %v690_v11   ;;  %1029 = vst.msk [vmem:[%s2286_s1 + $0xea] sm:$0x80] %vm708_vm9, %v690_v11   ;;  %v292_v23 = vpop.permute.xlu0 %291  }
  0x95   :  { %751 = vst.msk [vmem:[%s2286_s1 + $0x12] sm:$0x1] %vm3_vm2, %v64_v12   ;;  %752 = vst.msk [vmem:[%s2286_s1 + $0x31] sm:$0x2] %vm3_vm2, %v64_v12   ;;  %v313_v24 = vpop.permute.xlu1 %312  }
  0x96   :  { %753 = vst.msk [vmem:[%s2286_s1 + $0x50] sm:$0x4] %vm3_vm2, %v64_v12   ;;  %754 = vst.msk [vmem:[%s2286_s1 + $0x6f] sm:$0x8] %vm3_vm2, %v64_v12  }
  0x97   :  { %755 = vst.msk [vmem:[%s2286_s1 + $0x8e] sm:$0x10] %vm3_vm2, %v64_v12   ;;  %756 = vst.msk [vmem:[%s2286_s1 + $0xad] sm:$0x20] %vm3_vm2, %v64_v12  }
  0x98   :  { %757 = vst.msk [vmem:[%s2286_s1 + $0xcc] sm:$0x40] %vm3_vm2, %v64_v12   ;;  %758 = vst.msk [vmem:[%s2286_s1 + $0xeb] sm:$0x80] %vm3_vm2, %v64_v12   ;;  %v333_v25 = vpop.permute.xlu0 %332  }
  0x99   :  { %759 = vst.msk [vmem:[%s2286_s1 + $0x1] sm:$0x1] %vm3_vm2, %v84_v13   ;;  %760 = vst.msk [vmem:[%s2286_s1 + $0x20] sm:$0x2] %vm3_vm2, %v84_v13   ;;  %v354_v26 = vpop.permute.xlu1 %353  }
  0x9a   :  { %761 = vst.msk [vmem:[%s2286_s1 + $0x3f] sm:$0x4] %vm3_vm2, %v84_v13   ;;  %762 = vst.msk [vmem:[%s2286_s1 + $0x5e] sm:$0x8] %vm3_vm2, %v84_v13  }
  0x9b   :  { %763 = vst.msk [vmem:[%s2286_s1 + $0x7d] sm:$0x10] %vm3_vm2, %v84_v13   ;;  %764 = vst.msk [vmem:[%s2286_s1 + $0x9c] sm:$0x20] %vm3_vm2, %v84_v13  }
  0x9c   :  { %765 = vst.msk [vmem:[%s2286_s1 + $0xbb] sm:$0x40] %vm3_vm2, %v84_v13   ;;  %766 = vst.msk [vmem:[%s2286_s1 + $0xda] sm:$0x80] %vm3_vm2, %v84_v13   ;;  %v375_v27 = vpop.permute.xlu0 %374  }
  0x9d   :  { %768 = vst.msk [vmem:[%s2286_s1 + $0x1b] sm:$0x1] %vm3_vm2, %v105_v14   ;;  %769 = vst.msk [vmem:[%s2286_s1 + $0x3a] sm:$0x2] %vm3_vm2, %v105_v14   ;;  %v396_v28 = vpop.permute.xlu1 %395  }
  0x9e   :  { %770 = vst.msk [vmem:[%s2286_s1 + $0x59] sm:$0x4] %vm3_vm2, %v105_v14   ;;  %771 = vst.msk [vmem:[%s2286_s1 + $0x78] sm:$0x8] %vm3_vm2, %v105_v14  }
  0x9f   :  { %772 = vst.msk [vmem:[%s2286_s1 + $0x97] sm:$0x10] %vm3_vm2, %v105_v14   ;;  %773 = vst.msk [vmem:[%s2286_s1 + $0xb6] sm:$0x20] %vm3_vm2, %v105_v14  }
  0xa0   :  { %774 = vst.msk [vmem:[%s2286_s1 + $0xd5] sm:$0x40] %vm3_vm2, %v105_v14   ;;  %775 = vst.msk [vmem:[%s2286_s1 + $0xf4] sm:$0x80] %vm3_vm2, %v105_v14   ;;  %v416_v29 = vpop.permute.xlu0 %415  }
  0xa1   :  { %777 = vst.msk [vmem:[%s2286_s1 + $0xa] sm:$0x1] %vm3_vm2, %v126_v15   ;;  %778 = vst.msk [vmem:[%s2286_s1 + $0x29] sm:$0x2] %vm3_vm2, %v126_v15   ;;  %v437_v30 = vpop.permute.xlu1 %436  }
  0xa2   :  { %779 = vst.msk [vmem:[%s2286_s1 + $0x48] sm:$0x4] %vm3_vm2, %v126_v15   ;;  %780 = vst.msk [vmem:[%s2286_s1 + $0x67] sm:$0x8] %vm3_vm2, %v126_v15  }
  0xa3   :  { %781 = vst.msk [vmem:[%s2286_s1 + $0x86] sm:$0x10] %vm3_vm2, %v126_v15   ;;  %782 = vst.msk [vmem:[%s2286_s1 + $0xa5] sm:$0x20] %vm3_vm2, %v126_v15  }
  0xa4   :  { %783 = vst.msk [vmem:[%s2286_s1 + $0xc4] sm:$0x40] %vm3_vm2, %v126_v15   ;;  %784 = vst.msk [vmem:[%s2286_s1 + $0xe3] sm:$0x80] %vm3_vm2, %v126_v15   ;;  %v458_v31 = vpop.permute.xlu0 %457  }
  0xa5   :  { %786 = vst.msk [vmem:[%s2286_s1 + $0x13] sm:$0x1] %vm3_vm2, %v147_v16   ;;  %787 = vst.msk [vmem:[%s2286_s1 + $0x32] sm:$0x2] %vm3_vm2, %v147_v16   ;;  %v479_v32 = vpop.permute.xlu1 %478  }
  0xa6   :  { %788 = vst.msk [vmem:[%s2286_s1 + $0x51] sm:$0x4] %vm3_vm2, %v147_v16   ;;  %789 = vst.msk [vmem:[%s2286_s1 + $0x70] sm:$0x8] %vm3_vm2, %v147_v16  }
  0xa7   :  { %790 = vst.msk [vmem:[%s2286_s1 + $0x8f] sm:$0x10] %vm3_vm2, %v147_v16   ;;  %791 = vst.msk [vmem:[%s2286_s1 + $0xae] sm:$0x20] %vm3_vm2, %v147_v16  }
  0xa8   :  { %792 = vst.msk [vmem:[%s2286_s1 + $0xcd] sm:$0x40] %vm3_vm2, %v147_v16   ;;  %793 = vst.msk [vmem:[%s2286_s1 + $0xec] sm:$0x80] %vm3_vm2, %v147_v16   ;;  %v499_v33 = vpop.permute.xlu0 %498  }
  0xa9   :  { %794 = vst.msk [vmem:[%s2286_s1 + $0x2] sm:$0x1] %vm3_vm2, %v167_v17   ;;  %795 = vst.msk [vmem:[%s2286_s1 + $0x21] sm:$0x2] %vm3_vm2, %v167_v17   ;;  %v520_v34 = vpop.permute.xlu1 %519  }
  0xaa   :  { %796 = vst.msk [vmem:[%s2286_s1 + $0x40] sm:$0x4] %vm3_vm2, %v167_v17   ;;  %797 = vst.msk [vmem:[%s2286_s1 + $0x5f] sm:$0x8] %vm3_vm2, %v167_v17  }
  0xab   :  { %798 = vst.msk [vmem:[%s2286_s1 + $0x7e] sm:$0x10] %vm3_vm2, %v167_v17   ;;  %799 = vst.msk [vmem:[%s2286_s1 + $0x9d] sm:$0x20] %vm3_vm2, %v167_v17  }
  0xac   :  { %800 = vst.msk [vmem:[%s2286_s1 + $0xbc] sm:$0x40] %vm3_vm2, %v167_v17   ;;  %801 = vst.msk [vmem:[%s2286_s1 + $0xdb] sm:$0x80] %vm3_vm2, %v167_v17   ;;  %v541_v35 = vpop.permute.xlu0 %540  }
  0xad   :  { %803 = vst.msk [vmem:[%s2286_s1 + $0x1c] sm:$0x1] %vm3_vm2, %v188_v18   ;;  %804 = vst.msk [vmem:[%s2286_s1 + $0x3b] sm:$0x2] %vm3_vm2, %v188_v18   ;;  %v561_v36 = vpop.permute.xlu1 %560  }
  0xae   :  { %805 = vst.msk [vmem:[%s2286_s1 + $0x5a] sm:$0x4] %vm3_vm2, %v188_v18   ;;  %806 = vst.msk [vmem:[%s2286_s1 + $0x79] sm:$0x8] %vm3_vm2, %v188_v18  }
  0xaf   :  { %807 = vst.msk [vmem:[%s2286_s1 + $0x98] sm:$0x10] %vm3_vm2, %v188_v18   ;;  %808 = vst.msk [vmem:[%s2286_s1 + $0xb7] sm:$0x20] %vm3_vm2, %v188_v18  }
  0xb0   :  { %809 = vst.msk [vmem:[%s2286_s1 + $0xd6] sm:$0x40] %vm3_vm2, %v188_v18   ;;  %810 = vst.msk [vmem:[%s2286_s1 + $0xf5] sm:$0x80] %vm3_vm2, %v188_v18   ;;  %v582_v37 = vpop.permute.xlu0 %581  }
  0xb1   :  { %812 = vst.msk [vmem:[%s2286_s1 + $0xb] sm:$0x1] %vm3_vm2, %v209_v19   ;;  %813 = vst.msk [vmem:[%s2286_s1 + $0x2a] sm:$0x2] %vm3_vm2, %v209_v19  }
  0xb2   :  { %814 = vst.msk [vmem:[%s2286_s1 + $0x49] sm:$0x4] %vm3_vm2, %v209_v19   ;;  %815 = vst.msk [vmem:[%s2286_s1 + $0x68] sm:$0x8] %vm3_vm2, %v209_v19  }
  0xb3   :  { %816 = vst.msk [vmem:[%s2286_s1 + $0x87] sm:$0x10] %vm3_vm2, %v209_v19   ;;  %817 = vst.msk [vmem:[%s2286_s1 + $0xa6] sm:$0x20] %vm3_vm2, %v209_v19  }
  0xb4   :  { %818 = vst.msk [vmem:[%s2286_s1 + $0xc5] sm:$0x40] %vm3_vm2, %v209_v19   ;;  %819 = vst.msk [vmem:[%s2286_s1 + $0xe4] sm:$0x80] %vm3_vm2, %v209_v19  }
  0xb5   :  { %821 = vst.msk [vmem:[%s2286_s1 + $0x14] sm:$0x1] %vm3_vm2, %v230_v20   ;;  %822 = vst.msk [vmem:[%s2286_s1 + $0x33] sm:$0x2] %vm3_vm2, %v230_v20  }
  0xb6   :  { %823 = vst.msk [vmem:[%s2286_s1 + $0x52] sm:$0x4] %vm3_vm2, %v230_v20   ;;  %824 = vst.msk [vmem:[%s2286_s1 + $0x71] sm:$0x8] %vm3_vm2, %v230_v20  }
  0xb7   :  { %825 = vst.msk [vmem:[%s2286_s1 + $0x90] sm:$0x10] %vm3_vm2, %v230_v20   ;;  %826 = vst.msk [vmem:[%s2286_s1 + $0xaf] sm:$0x20] %vm3_vm2, %v230_v20  }
  0xb8   :  { %827 = vst.msk [vmem:[%s2286_s1 + $0xce] sm:$0x40] %vm3_vm2, %v230_v20   ;;  %828 = vst.msk [vmem:[%s2286_s1 + $0xed] sm:$0x80] %vm3_vm2, %v230_v20  }
  0xb9   :  { %829 = vst.msk [vmem:[%s2286_s1 + $0x3] sm:$0x1] %vm3_vm2, %v250_v21   ;;  %830 = vst.msk [vmem:[%s2286_s1 + $0x22] sm:$0x2] %vm3_vm2, %v250_v21  }
  0xba   :  { %831 = vst.msk [vmem:[%s2286_s1 + $0x41] sm:$0x4] %vm3_vm2, %v250_v21   ;;  %832 = vst.msk [vmem:[%s2286_s1 + $0x60] sm:$0x8] %vm3_vm2, %v250_v21  }
  0xbb   :  { %833 = vst.msk [vmem:[%s2286_s1 + $0x7f] sm:$0x10] %vm3_vm2, %v250_v21   ;;  %834 = vst.msk [vmem:[%s2286_s1 + $0x9e] sm:$0x20] %vm3_vm2, %v250_v21  }
  0xbc   :  { %835 = vst.msk [vmem:[%s2286_s1 + $0xbd] sm:$0x40] %vm3_vm2, %v250_v21   ;;  %836 = vst.msk [vmem:[%s2286_s1 + $0xdc] sm:$0x80] %vm3_vm2, %v250_v21  }
  0xbd   :  { %838 = vst.msk [vmem:[%s2286_s1 + $0x1d] sm:$0x1] %vm3_vm2, %v271_v22   ;;  %839 = vst.msk [vmem:[%s2286_s1 + $0x3c] sm:$0x2] %vm3_vm2, %v271_v22  }
  0xbe   :  { %840 = vst.msk [vmem:[%s2286_s1 + $0x5b] sm:$0x4] %vm3_vm2, %v271_v22   ;;  %841 = vst.msk [vmem:[%s2286_s1 + $0x7a] sm:$0x8] %vm3_vm2, %v271_v22  }
  0xbf   :  { %842 = vst.msk [vmem:[%s2286_s1 + $0x99] sm:$0x10] %vm3_vm2, %v271_v22   ;;  %843 = vst.msk [vmem:[%s2286_s1 + $0xb8] sm:$0x20] %vm3_vm2, %v271_v22  }
  0xc0   :  { %844 = vst.msk [vmem:[%s2286_s1 + $0xd7] sm:$0x40] %vm3_vm2, %v271_v22   ;;  %845 = vst.msk [vmem:[%s2286_s1 + $0xf6] sm:$0x80] %vm3_vm2, %v271_v22  }
  0xc1   :  { %847 = vst.msk [vmem:[%s2286_s1 + $0xc] sm:$0x1] %vm3_vm2, %v292_v23   ;;  %848 = vst.msk [vmem:[%s2286_s1 + $0x2b] sm:$0x2] %vm3_vm2, %v292_v23  }
  0xc2   :  { %849 = vst.msk [vmem:[%s2286_s1 + $0x4a] sm:$0x4] %vm3_vm2, %v292_v23   ;;  %850 = vst.msk [vmem:[%s2286_s1 + $0x69] sm:$0x8] %vm3_vm2, %v292_v23  }
  0xc3   :  { %851 = vst.msk [vmem:[%s2286_s1 + $0x88] sm:$0x10] %vm3_vm2, %v292_v23   ;;  %852 = vst.msk [vmem:[%s2286_s1 + $0xa7] sm:$0x20] %vm3_vm2, %v292_v23  }
  0xc4   :  { %853 = vst.msk [vmem:[%s2286_s1 + $0xc6] sm:$0x40] %vm3_vm2, %v292_v23   ;;  %854 = vst.msk [vmem:[%s2286_s1 + $0xe5] sm:$0x80] %vm3_vm2, %v292_v23  }
  0xc5   :  { %856 = vst.msk [vmem:[%s2286_s1 + $0x15] sm:$0x1] %vm3_vm2, %v313_v24   ;;  %857 = vst.msk [vmem:[%s2286_s1 + $0x34] sm:$0x2] %vm3_vm2, %v313_v24  }
  0xc6   :  { %858 = vst.msk [vmem:[%s2286_s1 + $0x53] sm:$0x4] %vm3_vm2, %v313_v24   ;;  %859 = vst.msk [vmem:[%s2286_s1 + $0x72] sm:$0x8] %vm3_vm2, %v313_v24  }
  0xc7   :  { %860 = vst.msk [vmem:[%s2286_s1 + $0x91] sm:$0x10] %vm3_vm2, %v313_v24   ;;  %861 = vst.msk [vmem:[%s2286_s1 + $0xb0] sm:$0x20] %vm3_vm2, %v313_v24  }
  0xc8   :  { %862 = vst.msk [vmem:[%s2286_s1 + $0xcf] sm:$0x40] %vm3_vm2, %v313_v24   ;;  %863 = vst.msk [vmem:[%s2286_s1 + $0xee] sm:$0x80] %vm3_vm2, %v313_v24  }
  0xc9   :  { %864 = vst.msk [vmem:[%s2286_s1 + $0x4] sm:$0x1] %vm3_vm2, %v333_v25   ;;  %865 = vst.msk [vmem:[%s2286_s1 + $0x23] sm:$0x2] %vm3_vm2, %v333_v25  }
  0xca   :  { %866 = vst.msk [vmem:[%s2286_s1 + $0x42] sm:$0x4] %vm3_vm2, %v333_v25   ;;  %867 = vst.msk [vmem:[%s2286_s1 + $0x61] sm:$0x8] %vm3_vm2, %v333_v25  }
  0xcb   :  { %868 = vst.msk [vmem:[%s2286_s1 + $0x80] sm:$0x10] %vm3_vm2, %v333_v25   ;;  %869 = vst.msk [vmem:[%s2286_s1 + $0x9f] sm:$0x20] %vm3_vm2, %v333_v25  }
  0xcc   :  { %870 = vst.msk [vmem:[%s2286_s1 + $0xbe] sm:$0x40] %vm3_vm2, %v333_v25   ;;  %871 = vst.msk [vmem:[%s2286_s1 + $0xdd] sm:$0x80] %vm3_vm2, %v333_v25  }
  0xcd   :  { %873 = vst.msk [vmem:[%s2286_s1 + $0x1e] sm:$0x1] %vm3_vm2, %v354_v26   ;;  %874 = vst.msk [vmem:[%s2286_s1 + $0x3d] sm:$0x2] %vm3_vm2, %v354_v26  }
  0xce   :  { %875 = vst.msk [vmem:[%s2286_s1 + $0x5c] sm:$0x4] %vm3_vm2, %v354_v26   ;;  %876 = vst.msk [vmem:[%s2286_s1 + $0x7b] sm:$0x8] %vm3_vm2, %v354_v26  }
  0xcf   :  { %877 = vst.msk [vmem:[%s2286_s1 + $0x9a] sm:$0x10] %vm3_vm2, %v354_v26   ;;  %878 = vst.msk [vmem:[%s2286_s1 + $0xb9] sm:$0x20] %vm3_vm2, %v354_v26  }
  0xd0   :  { %879 = vst.msk [vmem:[%s2286_s1 + $0xd8] sm:$0x40] %vm3_vm2, %v354_v26   ;;  %880 = vst.msk [vmem:[%s2286_s1 + $0xf7] sm:$0x80] %vm3_vm2, %v354_v26  }
  0xd1   :  { %882 = vst.msk [vmem:[%s2286_s1 + $0xd] sm:$0x1] %vm3_vm2, %v375_v27   ;;  %883 = vst.msk [vmem:[%s2286_s1 + $0x2c] sm:$0x2] %vm3_vm2, %v375_v27  }
  0xd2   :  { %884 = vst.msk [vmem:[%s2286_s1 + $0x4b] sm:$0x4] %vm3_vm2, %v375_v27   ;;  %885 = vst.msk [vmem:[%s2286_s1 + $0x6a] sm:$0x8] %vm3_vm2, %v375_v27  }
  0xd3   :  { %886 = vst.msk [vmem:[%s2286_s1 + $0x89] sm:$0x10] %vm3_vm2, %v375_v27   ;;  %887 = vst.msk [vmem:[%s2286_s1 + $0xa8] sm:$0x20] %vm3_vm2, %v375_v27  }
  0xd4   :  { %888 = vst.msk [vmem:[%s2286_s1 + $0xc7] sm:$0x40] %vm3_vm2, %v375_v27   ;;  %889 = vst.msk [vmem:[%s2286_s1 + $0xe6] sm:$0x80] %vm3_vm2, %v375_v27  }
  0xd5   :  { %891 = vst.msk [vmem:[%s2286_s1 + $0x16] sm:$0x1] %vm3_vm2, %v396_v28   ;;  %892 = vst.msk [vmem:[%s2286_s1 + $0x35] sm:$0x2] %vm3_vm2, %v396_v28  }
  0xd6   :  { %893 = vst.msk [vmem:[%s2286_s1 + $0x54] sm:$0x4] %vm3_vm2, %v396_v28   ;;  %894 = vst.msk [vmem:[%s2286_s1 + $0x73] sm:$0x8] %vm3_vm2, %v396_v28  }
  0xd7   :  { %895 = vst.msk [vmem:[%s2286_s1 + $0x92] sm:$0x10] %vm3_vm2, %v396_v28   ;;  %896 = vst.msk [vmem:[%s2286_s1 + $0xb1] sm:$0x20] %vm3_vm2, %v396_v28  }
  0xd8   :  { %897 = vst.msk [vmem:[%s2286_s1 + $0xd0] sm:$0x40] %vm3_vm2, %v396_v28   ;;  %898 = vst.msk [vmem:[%s2286_s1 + $0xef] sm:$0x80] %vm3_vm2, %v396_v28  }
  0xd9   :  { %899 = vst.msk [vmem:[%s2286_s1 + $0x5] sm:$0x1] %vm3_vm2, %v416_v29   ;;  %900 = vst.msk [vmem:[%s2286_s1 + $0x24] sm:$0x2] %vm3_vm2, %v416_v29  }
  0xda   :  { %901 = vst.msk [vmem:[%s2286_s1 + $0x43] sm:$0x4] %vm3_vm2, %v416_v29   ;;  %902 = vst.msk [vmem:[%s2286_s1 + $0x62] sm:$0x8] %vm3_vm2, %v416_v29  }
  0xdb   :  { %903 = vst.msk [vmem:[%s2286_s1 + $0x81] sm:$0x10] %vm3_vm2, %v416_v29   ;;  %904 = vst.msk [vmem:[%s2286_s1 + $0xa0] sm:$0x20] %vm3_vm2, %v416_v29  }
  0xdc   :  { %905 = vst.msk [vmem:[%s2286_s1 + $0xbf] sm:$0x40] %vm3_vm2, %v416_v29   ;;  %906 = vst.msk [vmem:[%s2286_s1 + $0xde] sm:$0x80] %vm3_vm2, %v416_v29  }
  0xdd   :  { %908 = vst.msk [vmem:[%s2286_s1 + $0x1f] sm:$0x1] %vm3_vm2, %v437_v30   ;;  %909 = vst.msk [vmem:[%s2286_s1 + $0x3e] sm:$0x2] %vm3_vm2, %v437_v30  }
  0xde   :  { %910 = vst.msk [vmem:[%s2286_s1 + $0x5d] sm:$0x4] %vm3_vm2, %v437_v30   ;;  %911 = vst.msk [vmem:[%s2286_s1 + $0x7c] sm:$0x8] %vm3_vm2, %v437_v30  }
  0xdf   :  { %912 = vst.msk [vmem:[%s2286_s1 + $0x9b] sm:$0x10] %vm3_vm2, %v437_v30   ;;  %913 = vst.msk [vmem:[%s2286_s1 + $0xba] sm:$0x20] %vm3_vm2, %v437_v30  }
  0xe0   :  { %914 = vst.msk [vmem:[%s2286_s1 + $0xd9] sm:$0x40] %vm3_vm2, %v437_v30   ;;  %915 = vst.msk [vmem:[%s2286_s1 + $0xf8] sm:$0x80] %vm3_vm2, %v437_v30  }
  0xe1   :  { %917 = vst.msk [vmem:[%s2286_s1 + $0xe] sm:$0x1] %vm3_vm2, %v458_v31   ;;  %918 = vst.msk [vmem:[%s2286_s1 + $0x2d] sm:$0x2] %vm3_vm2, %v458_v31  }
  0xe2   :  { %919 = vst.msk [vmem:[%s2286_s1 + $0x4c] sm:$0x4] %vm3_vm2, %v458_v31   ;;  %920 = vst.msk [vmem:[%s2286_s1 + $0x6b] sm:$0x8] %vm3_vm2, %v458_v31  }
  0xe3   :  { %921 = vst.msk [vmem:[%s2286_s1 + $0x8a] sm:$0x10] %vm3_vm2, %v458_v31   ;;  %922 = vst.msk [vmem:[%s2286_s1 + $0xa9] sm:$0x20] %vm3_vm2, %v458_v31  }
  0xe4   :  { %923 = vst.msk [vmem:[%s2286_s1 + $0xc8] sm:$0x40] %vm3_vm2, %v458_v31   ;;  %924 = vst.msk [vmem:[%s2286_s1 + $0xe7] sm:$0x80] %vm3_vm2, %v458_v31  }
  0xe5   :  { %926 = vst.msk [vmem:[%s2286_s1 + $0x17] sm:$0x1] %vm3_vm2, %v479_v32   ;;  %927 = vst.msk [vmem:[%s2286_s1 + $0x36] sm:$0x2] %vm3_vm2, %v479_v32  }
  0xe6   :  { %928 = vst.msk [vmem:[%s2286_s1 + $0x55] sm:$0x4] %vm3_vm2, %v479_v32   ;;  %929 = vst.msk [vmem:[%s2286_s1 + $0x74] sm:$0x8] %vm3_vm2, %v479_v32  }
  0xe7   :  { %930 = vst.msk [vmem:[%s2286_s1 + $0x93] sm:$0x10] %vm3_vm2, %v479_v32   ;;  %931 = vst.msk [vmem:[%s2286_s1 + $0xb2] sm:$0x20] %vm3_vm2, %v479_v32  }
  0xe8   :  { %932 = vst.msk [vmem:[%s2286_s1 + $0xd1] sm:$0x40] %vm3_vm2, %v479_v32   ;;  %933 = vst.msk [vmem:[%s2286_s1 + $0xf0] sm:$0x80] %vm3_vm2, %v479_v32  }
  0xe9   :  { %934 = vst.msk [vmem:[%s2286_s1 + $0x6] sm:$0x1] %vm3_vm2, %v499_v33   ;;  %935 = vst.msk [vmem:[%s2286_s1 + $0x25] sm:$0x2] %vm3_vm2, %v499_v33  }
  0xea   :  { %936 = vst.msk [vmem:[%s2286_s1 + $0x44] sm:$0x4] %vm3_vm2, %v499_v33   ;;  %937 = vst.msk [vmem:[%s2286_s1 + $0x63] sm:$0x8] %vm3_vm2, %v499_v33  }
  0xeb   :  { %938 = vst.msk [vmem:[%s2286_s1 + $0x82] sm:$0x10] %vm3_vm2, %v499_v33   ;;  %939 = vst.msk [vmem:[%s2286_s1 + $0xa1] sm:$0x20] %vm3_vm2, %v499_v33  }
  0xec   :  { %940 = vst.msk [vmem:[%s2286_s1 + $0xc0] sm:$0x40] %vm3_vm2, %v499_v33   ;;  %941 = vst.msk [vmem:[%s2286_s1 + $0xdf] sm:$0x80] %vm3_vm2, %v499_v33  }
  0xed   :  { %943 = vst.msk [vmem:[%s2286_s1 + $0xf] sm:$0x1] %vm3_vm2, %v520_v34   ;;  %944 = vst.msk [vmem:[%s2286_s1 + $0x2e] sm:$0x2] %vm3_vm2, %v520_v34  }
  0xee   :  { %945 = vst.msk [vmem:[%s2286_s1 + $0x4d] sm:$0x4] %vm3_vm2, %v520_v34   ;;  %946 = vst.msk [vmem:[%s2286_s1 + $0x6c] sm:$0x8] %vm3_vm2, %v520_v34  }
  0xef   :  { %947 = vst.msk [vmem:[%s2286_s1 + $0x8b] sm:$0x10] %vm3_vm2, %v520_v34   ;;  %948 = vst.msk [vmem:[%s2286_s1 + $0xaa] sm:$0x20] %vm3_vm2, %v520_v34  }
  0xf0   :  { %949 = vst.msk [vmem:[%s2286_s1 + $0xc9] sm:$0x40] %vm3_vm2, %v520_v34   ;;  %950 = vst.msk [vmem:[%s2286_s1 + $0xe8] sm:$0x80] %vm3_vm2, %v520_v34  }
  0xf1   :  { %952 = vst.msk [vmem:[%s2286_s1 + $0x18] sm:$0x1] %vm3_vm2, %v541_v35   ;;  %953 = vst.msk [vmem:[%s2286_s1 + $0x37] sm:$0x2] %vm3_vm2, %v541_v35  }
  0xf2   :  { %954 = vst.msk [vmem:[%s2286_s1 + $0x56] sm:$0x4] %vm3_vm2, %v541_v35   ;;  %955 = vst.msk [vmem:[%s2286_s1 + $0x75] sm:$0x8] %vm3_vm2, %v541_v35  }
  0xf3   :  { %956 = vst.msk [vmem:[%s2286_s1 + $0x94] sm:$0x10] %vm3_vm2, %v541_v35   ;;  %957 = vst.msk [vmem:[%s2286_s1 + $0xb3] sm:$0x20] %vm3_vm2, %v541_v35  }
  0xf4   :  { %958 = vst.msk [vmem:[%s2286_s1 + $0xd2] sm:$0x40] %vm3_vm2, %v541_v35   ;;  %959 = vst.msk [vmem:[%s2286_s1 + $0xf1] sm:$0x80] %vm3_vm2, %v541_v35  }
  0xf5   :  { %960 = vst.msk [vmem:[%s2286_s1 + $0x7] sm:$0x1] %vm3_vm2, %v561_v36   ;;  %961 = vst.msk [vmem:[%s2286_s1 + $0x26] sm:$0x2] %vm3_vm2, %v561_v36  }
  0xf6   :  { %962 = vst.msk [vmem:[%s2286_s1 + $0x45] sm:$0x4] %vm3_vm2, %v561_v36   ;;  %963 = vst.msk [vmem:[%s2286_s1 + $0x64] sm:$0x8] %vm3_vm2, %v561_v36  }
  0xf7   :  { %964 = vst.msk [vmem:[%s2286_s1 + $0x83] sm:$0x10] %vm3_vm2, %v561_v36   ;;  %965 = vst.msk [vmem:[%s2286_s1 + $0xa2] sm:$0x20] %vm3_vm2, %v561_v36  }
  0xf8   :  { %966 = vst.msk [vmem:[%s2286_s1 + $0xc1] sm:$0x40] %vm3_vm2, %v561_v36   ;;  %967 = vst.msk [vmem:[%s2286_s1 + $0xe0] sm:$0x80] %vm3_vm2, %v561_v36  }
  0xf9   :  { %969 = vst.msk [vmem:[%s2286_s1 + $0x10] sm:$0x1] %vm3_vm2, %v582_v37   ;;  %970 = vst.msk [vmem:[%s2286_s1 + $0x2f] sm:$0x2] %vm3_vm2, %v582_v37  }
  0xfa   :  { %971 = vst.msk [vmem:[%s2286_s1 + $0x4e] sm:$0x4] %vm3_vm2, %v582_v37   ;;  %972 = vst.msk [vmem:[%s2286_s1 + $0x6d] sm:$0x8] %vm3_vm2, %v582_v37  }
  0xfb   :  { %973 = vst.msk [vmem:[%s2286_s1 + $0x8c] sm:$0x10] %vm3_vm2, %v582_v37   ;;  %974 = vst.msk [vmem:[%s2286_s1 + $0xab] sm:$0x20] %vm3_vm2, %v582_v37  }
  0xfc   :  { %975 = vst.msk [vmem:[%s2286_s1 + $0xca] sm:$0x40] %vm3_vm2, %v582_v37   ;;  %976 = vst.msk [vmem:[%s2286_s1 + $0xe9] sm:$0x80] %vm3_vm2, %v582_v37  }

</bundles_post_ra>
